<compile_context>
chip_gen: v6e
topology: v6e:2x2x1
jax: 0.10.0
libtpu: 0.0.40
codegen_flags: <defaults>
</compile_context>

<pallas_src>
import numpy as np
import jax
import jax.numpy as jnp
from jax import lax
from jax.experimental import pallas as pl
from jax.experimental.pallas import tpu as pltpu

# ----------------------- problem sizes (small, synthetic) -----------------------
NUM_ENT   = 32    # num_entities
NUM_REL   = 5     # num_relations
REL_PAD   = 8     # emb_rel padded to 8 rows for clean sublane tiling
INIT_EMB  = 16    # args.init_emb_size
GC1_EMB   = 32    # args.gc1_emb_size
EMB_DIM   = 32    # args.embedding_dim
CHANNELS  = 4     # args.channels
KSIZE     = 3     # args.kernel_size
BATCH     = 2
E_TRAIN   = 40    # number of training edges (graph gets fwd + reverse + self-loop)
BN_EPS    = 1e-5


def _vmem():
    return pl.BlockSpec(memory_space=pltpu.MemorySpace.VMEM)


def _smem():
    return pl.BlockSpec(memory_space=pltpu.MemorySpace.SMEM)


# ================================ fused Pallas kernel ================================

def _sacn_kernel(ent_ref, e1_ref, rel_ref,
                 emb_e_ref, emb_rel_ref,
                 adj1_ref, gc1_w_ref, gc1_b_ref, bn3_s_ref, bn3_h_ref,
                 adj2_ref, gc2_w_ref, gc2_b_ref, bn4_s_ref, bn4_h_ref,
                 conv_w_ref, conv_b_ref, bn0_s_ref, bn0_h_ref, bn1_s_ref, bn1_h_ref,
                 fc_w_ref, fc_b_ref, bn2_s_ref, bn2_h_ref,
                 pred_ref):
    f32 = jnp.float32
    N = adj1_ref.shape[0]
    B = e1_ref.shape[0]
    D = gc2_w_ref.shape[1]
    R = emb_rel_ref.shape[0]
    C = conv_b_ref.shape[0]
    Cin = bn0_s_ref.shape[0]
    K = conv_w_ref.shape[0] // (C * Cin)
    pad = K // 2

    # ---- emb_e(entity_id): in-kernel row gather as a one-hot matmul (MXU) ----
    ent_oh = (lax.broadcasted_iota(jnp.int32, (N, N), 1) == ent_ref[...]).astype(f32)
    emb_init = jnp.dot(ent_oh, emb_e_ref[...], preferred_element_type=f32)   # (N, INIT)

    # ---- gc1 -> bn3 -> tanh  (dropout = identity in eval) ----
    h1 = jnp.dot(emb_init, gc1_w_ref[...], preferred_element_type=f32)
    h1 = jnp.dot(adj1_ref[...], h1, preferred_element_type=f32) + gc1_b_ref[...]
    x1 = jnp.tanh(h1 * bn3_s_ref[...] + bn3_h_ref[...])                      # (N, GC1)

    # ---- gc2 -> bn4 -> tanh = e_all  (dropout = identity in eval) ----
    h2 = jnp.dot(x1, gc2_w_ref[...], preferred_element_type=f32)
    h2 = jnp.dot(adj2_ref[...], h2, preferred_element_type=f32) + gc2_b_ref[...]
    e_all = jnp.tanh(h2 * bn4_s_ref[...] + bn4_h_ref[...])                   # (N, D)

    # ---- e_all[e1], emb_rel[rel]: in-kernel selection via one-hot matmuls ----
    e1_oh = (lax.broadcasted_iota(jnp.int32, (B, N), 1) == e1_ref[...]).astype(f32)
    e1_emb = jnp.dot(e1_oh, e_all, preferred_element_type=f32)               # (B, D)
    rel_oh = (lax.broadcasted_iota(jnp.int32, (B, R), 1) == rel_ref[...]).astype(f32)
    rel_emb = jnp.dot(rel_oh, emb_rel_ref[...], preferred_element_type=f32)  # (B, D)

    # ---- bn0 (per input channel; scalar params from SMEM) ----
    chans = (e1_emb * bn0_s_ref[0] + bn0_h_ref[0],
             rel_emb * bn0_s_ref[1] + bn0_h_ref[1])

    # ---- Conv1d(2, C, K, padding=K//2): value-level shifted views, no scratch ----
    zcol = jnp.zeros((B, pad), f32)
    shifted = []
    for x in chans:
        xp = jnp.concatenate([zcol, x, zcol], axis=1)          # (B, D + 2*pad)
        shifted.append([xp[:, k:k + D] for k in range(K)])     # hoisted shifted views

    # ---- conv taps (SMEM scalars) + bias + bn1 + relu; lane-dense (B, C*D) slab ----
    flat_parts = []
    for c in range(C):
        acc = jnp.zeros((B, D), f32)
        for i in range(Cin):
            for k in range(K):
                acc = acc + conv_w_ref[(c * Cin + i) * K + k] * shifted[i][k]
        y = (acc + conv_b_ref[c]) * bn1_s_ref[c] + bn1_h_ref[c]
        flat_parts.append(jnp.maximum(y, 0.0))
    flat = jnp.concatenate(flat_parts, axis=1)                 # (B, C*D), c-major = .view

    # ---- fc -> bn2 -> relu  (hidden_drop = identity in eval) ----
    h = jnp.dot(flat, fc_w_ref[...], preferred_element_type=f32) + fc_b_ref[...]
    h = jnp.maximum(h * bn2_s_ref[...] + bn2_h_ref[...], 0.0)                # (B, D)

    # ---- scores: h @ e_all.T without materializing the transpose ----
    logits = lax.dot_general(h, e_all, (((1,), (1,)), ((), ())),
                             preferred_element_type=f32)                     # (B, N)
    # sigmoid; saturates cleanly to {0, 1} for large |logits|, never NaN
    pred_ref[...] = 1.0 / (1.0 + jnp.exp(-logits))


# ================================ wrapper ================================

def sacn_forward(p, adj1, adj2, e1, rel, entity_id):
    B = int(e1.shape[0])
    N = int(adj1.shape[0])
    D = int(p["gc2_w"].shape[1])
    init = int(p["gc1_w"].shape[0])
    g1 = int(p["gc1_w"].shape[1])
    R = int(p["emb_rel_pad"].shape[0])
    C = int(p["conv_b"].shape[0])
    cin = int(p["bn0_s"].shape[0])
    K = int(p["conv_w_flat"].shape[0]) // (C * cin)

    args = (entity_id.reshape(N, 1).astype(jnp.int32),
            e1.reshape(B, 1).astype(jnp.int32),
            rel.reshape(B, 1).astype(jnp.int32),
            p["emb_e"], p["emb_rel_pad"],
            adj1, p["gc1_w"], p["gc1_b_row"], p["bn3_s_row"], p["bn3_h_row"],
            adj2, p["gc2_w"], p["gc2_b_row"], p["bn4_s_row"], p["bn4_h_row"],
            p["conv_w_flat"], p["conv_b"], p["bn0_s"], p["bn0_h"], p["bn1_s"], p["bn1_h"],
            p["fc_w_t"], p["fc_b_row"], p["bn2_s_row"], p["bn2_h_row"])

    flops = 2 * (N * N * init + N * init * g1 + N * N * g1 + N * g1 * D + N * N * D
                 + B * N * D + B * R * D + B * cin * K * C * D + B * C * D * D + B * D * N)
    transcendentals = N * g1 + N * D + B * N
    bytes_accessed = sum(int(np.prod(a.shape)) * a.dtype.itemsize for a in args) + B * N * 4

    return pl.pallas_call(
        _sacn_kernel,
        out_shape=jax.ShapeDtypeStruct((B, N), jnp.float32),
        in_specs=[_vmem()] * 15 + [_smem()] * 6 + [_vmem()] * 4,
        out_specs=_vmem(),
        cost_estimate=pl.CostEstimate(flops=flops, transcendentals=transcendentals,
                                      bytes_accessed=bytes_accessed),
    )(*args)


# ============================== pure-JAX reference ==============================

HI = lax.Precision.HIGHEST


def reference_forward(raw, adj1, adj2, e1, rel, entity_id):
    emb_initial = raw["emb_e"][entity_id]
    x = jnp.dot(adj1, jnp.dot(emb_initial, raw["gc1_w"], precision=HI),
                precision=HI) + raw["gc1_b"]
    x = jnp.tanh(x * raw["bn3_s"] + raw["bn3_h"])
    x = jnp.dot(adj2, jnp.dot(x, raw["gc2_w"], precision=HI),
                precision=HI) + raw["gc2_b"]
    e_all = jnp.tanh(x * raw["bn4_s"] + raw["bn4_h"])
    e1_emb = e_all[e1[:, 0]][:, None, :]
    rel_emb = raw["emb_rel"][rel[:, 0]][:, None, :]
    stacked = jnp.concatenate([e1_emb, rel_emb], axis=1)                 # (B, 2, D)
    xn = stacked * raw["bn0_s"][None, :, None] + raw["bn0_h"][None, :, None]
    pad = KSIZE // 2
    xpad = jnp.pad(xn, ((0, 0), (0, 0), (pad, pad)))
    patches = jnp.stack([xpad[:, :, k:k + EMB_DIM] for k in range(KSIZE)], axis=-1)
    conv = jnp.einsum("bidk,cik->bcd", patches, raw["conv_w"], precision=HI) \
        + raw["conv_b"][None, :, None]
    fm = jnp.maximum(conv * raw["bn1_s"][None, :, None] + raw["bn1_h"][None, :, None], 0.0)
    flat = fm.reshape(stacked.shape[0], -1)
    h = jnp.dot(flat, raw["fc_w"].T, precision=HI) + raw["fc_b"]
    h = jnp.maximum(h * raw["bn2_s"] + raw["bn2_h"], 0.0)
    logits = jnp.dot(h, e_all.T, precision=HI)
    return jax.nn.sigmoid(logits)


# ===================================== main =====================================

if __name__ == "__main__":
    key = jax.random.PRNGKey(0)
    keys = iter(jax.random.split(key, 64))

    def nrm(shape, scale=0.1):
        return scale * jax.random.normal(next(keys), shape, dtype=jnp.float32)

    def bn_params(n):
        g = 1.0 + 0.1 * jax.random.normal(next(keys), (n,), jnp.float32)
        b = 0.1 * jax.random.normal(next(keys), (n,), jnp.float32)
        rm = 0.1 * jax.random.normal(next(keys), (n,), jnp.float32)
        rv = 1.0 + 0.1 * jax.random.uniform(next(keys), (n,), jnp.float32)
        scale = g / jnp.sqrt(rv + BN_EPS)
        shift = b - rm * scale
        return scale, shift

    # ---- parameters (deterministic synthetic init; shapes follow the module) ----
    emb_e = nrm((NUM_ENT, INIT_EMB)).at[0].set(0.0)          # padding_idx=0
    gc1_w = nrm((INIT_EMB, GC1_EMB)); gc1_b = nrm((GC1_EMB,))
    alpha1 = nrm((NUM_REL + 1, 1)).at[0].set(0.0)            # gc1.alpha, padding_idx=0
    gc2_w = nrm((GC1_EMB, EMB_DIM)); gc2_b = nrm((EMB_DIM,))
    alpha2 = nrm((NUM_REL + 1, 1)).at[0].set(0.0)            # gc2.alpha, padding_idx=0
    emb_rel = nrm((NUM_REL, EMB_DIM)).at[0].set(0.0)         # padding_idx=0
    conv_w = nrm((CHANNELS, 2, KSIZE)); conv_b = nrm((CHANNELS,))
    fc_w = nrm((EMB_DIM, EMB_DIM * CHANNELS)); fc_b = nrm((EMB_DIM,))
    _b_ent = jnp.zeros((NUM_ENT,), jnp.float32)              # registered 'b': unused in fwd

    bn0_s, bn0_h = bn_params(2)
    bn1_s, bn1_h = bn_params(CHANNELS)
    bn2_s, bn2_h = bn_params(EMB_DIM)
    bn3_s, bn3_h = bn_params(GC1_EMB)
    bn4_s, bn4_h = bn_params(EMB_DIM)
    # bn_init exists in __init__ but is unused in forward.

    # ---- synthetic graph (forward edges, reverse edges, self-loops) ----
    src = jax.random.randint(next(keys), (E_TRAIN,), 0, NUM_ENT)
    dst = jax.random.randint(next(keys), (E_TRAIN,), 0, NUM_ENT)
    etype = jax.random.randint(next(keys), (E_TRAIN,), 1, NUM_REL + 1)
    self_type = jnp.full((NUM_ENT,), NUM_REL, dtype=jnp.int32)
    all_edge_type = jnp.concatenate([etype, etype, self_type]).astype(jnp.int32)
    srcs = jnp.concatenate([src, dst, jnp.arange(NUM_ENT)])
    dsts = jnp.concatenate([dst, src, jnp.arange(NUM_ENT)])
    E = E_TRAIN
    transpose_type = jnp.concatenate(
        [all_edge_type[E:2 * E], all_edge_type[:E], all_edge_type[-NUM_ENT:]])

    def dense_adj(alpha_tbl):
        alp = alpha_tbl[all_edge_type, 0] + alpha_tbl[transpose_type, 0]
        return jnp.zeros((NUM_ENT, NUM_ENT), jnp.float32).at[dsts, srcs].add(alp)

    adj1 = dense_adj(alpha1)   # used by gc1
    adj2 = dense_adj(alpha2)   # used by gc2

    # ---- batch inputs ----
    e1 = jax.random.randint(next(keys), (BATCH, 1), 0, NUM_ENT)
    rel = jax.random.randint(next(keys), (BATCH, 1), 0, NUM_REL)
    entity_id = jnp.arange(NUM_ENT, dtype=jnp.int32)

    # ---- repack params once for the fused kernel ----
    emb_rel_pad = jnp.zeros((REL_PAD, EMB_DIM), jnp.float32).at[:NUM_REL].set(emb_rel)
    params = dict(
        emb_e=emb_e, emb_rel_pad=emb_rel_pad,
        gc1_w=gc1_w, gc1_b_row=gc1_b.reshape(1, -1),
        bn3_s_row=bn3_s.reshape(1, -1), bn3_h_row=bn3_h.reshape(1, -1),
        gc2_w=gc2_w, gc2_b_row=gc2_b.reshape(1, -1),
        bn4_s_row=bn4_s.reshape(1, -1), bn4_h_row=bn4_h.reshape(1, -1),
        conv_w_flat=conv_w.reshape(-1),            # (C*2*K,) in (c, i, k) order -> SMEM
        conv_b=conv_b, bn0_s=bn0_s, bn0_h=bn0_h, bn1_s=bn1_s, bn1_h=bn1_h,   # SMEM scalars
        fc_w_t=fc_w.T, fc_b_row=fc_b.reshape(1, -1),
        bn2_s_row=bn2_s.reshape(1, -1), bn2_h_row=bn2_h.reshape(1, -1),
    )

    pred = jax.block_until_ready(sacn_forward(params, adj1, adj2, e1, rel, entity_id))

    raw = dict(emb_e=emb_e, emb_rel=emb_rel, gc1_w=gc1_w, gc1_b=gc1_b,
               gc2_w=gc2_w, gc2_b=gc2_b, conv_w=conv_w, conv_b=conv_b,
               fc_w=fc_w, fc_b=fc_b,
               bn0_s=bn0_s, bn0_h=bn0_h, bn1_s=bn1_s, bn1_h=bn1_h,
               bn2_s=bn2_s, bn2_h=bn2_h, bn3_s=bn3_s, bn3_h=bn3_h,
               bn4_s=bn4_s, bn4_h=bn4_h)
    pred_ref = jax.block_until_ready(
        reference_forward(raw, adj1, adj2, e1, rel, entity_id))

    assert pred.shape == (BATCH, NUM_ENT)
    assert bool(jnp.all(jnp.isfinite(pred)))
    assert np.allclose(np.asarray(pred), np.asarray(pred_ref), atol=2e-3, rtol=2e-3)

    print("KERNEL_OK")
</pallas_src>

<mosaic_0001>
module attributes {stable_mosaic.version = 11 : i64} {
  func.func @_sacn_kernel(%arg0: memref<32x1xi32, #tpu.memory_space<vmem>>, %arg1: memref<2x1xi32, #tpu.memory_space<vmem>>, %arg2: memref<2x1xi32, #tpu.memory_space<vmem>>, %arg3: memref<32x16xf32, #tpu.memory_space<vmem>>, %arg4: memref<8x32xf32, #tpu.memory_space<vmem>>, %arg5: memref<32x32xf32, #tpu.memory_space<vmem>>, %arg6: memref<16x32xf32, #tpu.memory_space<vmem>>, %arg7: memref<1x32xf32, #tpu.memory_space<vmem>>, %arg8: memref<1x32xf32, #tpu.memory_space<vmem>>, %arg9: memref<1x32xf32, #tpu.memory_space<vmem>>, %arg10: memref<32x32xf32, #tpu.memory_space<vmem>>, %arg11: memref<32x32xf32, #tpu.memory_space<vmem>>, %arg12: memref<1x32xf32, #tpu.memory_space<vmem>>, %arg13: memref<1x32xf32, #tpu.memory_space<vmem>>, %arg14: memref<1x32xf32, #tpu.memory_space<vmem>>, %arg15: memref<24xf32, #tpu.memory_space<smem>>, %arg16: memref<4xf32, #tpu.memory_space<smem>>, %arg17: memref<2xf32, #tpu.memory_space<smem>>, %arg18: memref<2xf32, #tpu.memory_space<smem>>, %arg19: memref<4xf32, #tpu.memory_space<smem>>, %arg20: memref<4xf32, #tpu.memory_space<smem>>, %arg21: memref<128x32xf32, #tpu.memory_space<vmem>>, %arg22: memref<1x32xf32, #tpu.memory_space<vmem>>, %arg23: memref<1x32xf32, #tpu.memory_space<vmem>>, %arg24: memref<1x32xf32, #tpu.memory_space<vmem>>, %arg25: memref<2x32xf32, #tpu.memory_space<vmem>>) attributes {dimension_semantics = [], scalar_prefetch = 0 : i64, scratch_operands = 0 : i64, tpu.core_type = #tpu.core_type<tc>} {
    %0 = tpu.iota {dimensions = array<i32: 1>} : vector<32x32xi32>
    %c0 = arith.constant 0 : index
    %c0_0 = arith.constant 0 : index
    %1 = vector.load %arg0[%c0, %c0_0] : memref<32x1xi32, #tpu.memory_space<vmem>>, vector<32x1xi32>
    %2 = vector.broadcast %1 : vector<32x1xi32> to vector<32x32xi32>
    %3 = arith.cmpi eq, %0, %2 : vector<32x32xi32>
    %4 = arith.extui %3 : vector<32x32xi1> to vector<32x32xi32>
    %5 = arith.sitofp %4 : vector<32x32xi32> to vector<32x32xf32>
    %c0_1 = arith.constant 0 : index
    %c0_2 = arith.constant 0 : index
    %6 = vector.load %arg3[%c0_1, %c0_2] : memref<32x16xf32, #tpu.memory_space<vmem>>, vector<32x16xf32>
    %cst = arith.constant dense<0.000000e+00> : vector<32x16xf32>
    %7 = tpu.matmul %5, %6, %cst {dimension_numbers = #tpu.dot_dimension_numbers<[1], [0], [0], [1], [0, 0, 1, 1], [], []>} : vector<32x32xf32>, vector<32x16xf32>, vector<32x16xf32> -> vector<32x16xf32>
    %c0_3 = arith.constant 0 : index
    %c0_4 = arith.constant 0 : index
    %8 = vector.load %arg6[%c0_3, %c0_4] : memref<16x32xf32, #tpu.memory_space<vmem>>, vector<16x32xf32>
    %cst_5 = arith.constant dense<0.000000e+00> : vector<32x32xf32>
    %9 = tpu.matmul %7, %8, %cst_5 {dimension_numbers = #tpu.dot_dimension_numbers<[1], [0], [0], [1], [0, 0, 1, 1], [], []>} : vector<32x16xf32>, vector<16x32xf32>, vector<32x32xf32> -> vector<32x32xf32>
    %c0_6 = arith.constant 0 : index
    %c0_7 = arith.constant 0 : index
    %10 = vector.load %arg5[%c0_6, %c0_7] : memref<32x32xf32, #tpu.memory_space<vmem>>, vector<32x32xf32>
    %cst_8 = arith.constant dense<0.000000e+00> : vector<32x32xf32>
    %11 = tpu.matmul %10, %9, %cst_8 {dimension_numbers = #tpu.dot_dimension_numbers<[1], [0], [0], [1], [0, 0, 1, 1], [], []>} : vector<32x32xf32>, vector<32x32xf32>, vector<32x32xf32> -> vector<32x32xf32>
    %c0_9 = arith.constant 0 : index
    %c0_10 = arith.constant 0 : index
    %12 = vector.load %arg7[%c0_9, %c0_10] : memref<1x32xf32, #tpu.memory_space<vmem>>, vector<1x32xf32>
    %13 = vector.broadcast %12 : vector<1x32xf32> to vector<32x32xf32>
    %14 = arith.addf %11, %13 : vector<32x32xf32>
    %c0_11 = arith.constant 0 : index
    %c0_12 = arith.constant 0 : index
    %15 = vector.load %arg8[%c0_11, %c0_12] : memref<1x32xf32, #tpu.memory_space<vmem>>, vector<1x32xf32>
    %16 = vector.broadcast %15 : vector<1x32xf32> to vector<32x32xf32>
    %17 = arith.mulf %14, %16 : vector<32x32xf32>
    %c0_13 = arith.constant 0 : index
    %c0_14 = arith.constant 0 : index
    %18 = vector.load %arg9[%c0_13, %c0_14] : memref<1x32xf32, #tpu.memory_space<vmem>>, vector<1x32xf32>
    %19 = vector.broadcast %18 : vector<1x32xf32> to vector<32x32xf32>
    %20 = arith.addf %17, %19 : vector<32x32xf32>
    %21 = math.tanh %20 : vector<32x32xf32>
    %c0_15 = arith.constant 0 : index
    %c0_16 = arith.constant 0 : index
    %22 = vector.load %arg11[%c0_15, %c0_16] : memref<32x32xf32, #tpu.memory_space<vmem>>, vector<32x32xf32>
    %cst_17 = arith.constant dense<0.000000e+00> : vector<32x32xf32>
    %23 = tpu.matmul %21, %22, %cst_17 {dimension_numbers = #tpu.dot_dimension_numbers<[1], [0], [0], [1], [0, 0, 1, 1], [], []>} : vector<32x32xf32>, vector<32x32xf32>, vector<32x32xf32> -> vector<32x32xf32>
    %c0_18 = arith.constant 0 : index
    %c0_19 = arith.constant 0 : index
    %24 = vector.load %arg10[%c0_18, %c0_19] : memref<32x32xf32, #tpu.memory_space<vmem>>, vector<32x32xf32>
    %cst_20 = arith.constant dense<0.000000e+00> : vector<32x32xf32>
    %25 = tpu.matmul %24, %23, %cst_20 {dimension_numbers = #tpu.dot_dimension_numbers<[1], [0], [0], [1], [0, 0, 1, 1], [], []>} : vector<32x32xf32>, vector<32x32xf32>, vector<32x32xf32> -> vector<32x32xf32>
    %c0_21 = arith.constant 0 : index
    %c0_22 = arith.constant 0 : index
    %26 = vector.load %arg12[%c0_21, %c0_22] : memref<1x32xf32, #tpu.memory_space<vmem>>, vector<1x32xf32>
    %27 = vector.broadcast %26 : vector<1x32xf32> to vector<32x32xf32>
    %28 = arith.addf %25, %27 : vector<32x32xf32>
    %c0_23 = arith.constant 0 : index
    %c0_24 = arith.constant 0 : index
    %29 = vector.load %arg13[%c0_23, %c0_24] : memref<1x32xf32, #tpu.memory_space<vmem>>, vector<1x32xf32>
    %30 = vector.broadcast %29 : vector<1x32xf32> to vector<32x32xf32>
    %31 = arith.mulf %28, %30 : vector<32x32xf32>
    %c0_25 = arith.constant 0 : index
    %c0_26 = arith.constant 0 : index
    %32 = vector.load %arg14[%c0_25, %c0_26] : memref<1x32xf32, #tpu.memory_space<vmem>>, vector<1x32xf32>
    %33 = vector.broadcast %32 : vector<1x32xf32> to vector<32x32xf32>
    %34 = arith.addf %31, %33 : vector<32x32xf32>
    %35 = math.tanh %34 : vector<32x32xf32>
    %36 = tpu.iota {dimensions = array<i32: 1>} : vector<2x32xi32>
    %c0_27 = arith.constant 0 : index
    %c0_28 = arith.constant 0 : index
    %37 = vector.load %arg1[%c0_27, %c0_28] : memref<2x1xi32, #tpu.memory_space<vmem>>, vector<2x1xi32>
    %38 = vector.broadcast %37 : vector<2x1xi32> to vector<2x32xi32>
    %39 = arith.cmpi eq, %36, %38 : vector<2x32xi32>
    %40 = arith.extui %39 : vector<2x32xi1> to vector<2x32xi32>
    %41 = arith.sitofp %40 : vector<2x32xi32> to vector<2x32xf32>
    %cst_29 = arith.constant dense<0.000000e+00> : vector<2x32xf32>
    %42 = tpu.matmul %41, %35, %cst_29 {dimension_numbers = #tpu.dot_dimension_numbers<[1], [0], [0], [1], [0, 0, 1, 1], [], []>} : vector<2x32xf32>, vector<32x32xf32>, vector<2x32xf32> -> vector<2x32xf32>
    %43 = tpu.iota {dimensions = array<i32: 1>} : vector<2x8xi32>
    %c0_30 = arith.constant 0 : index
    %c0_31 = arith.constant 0 : index
    %44 = vector.load %arg2[%c0_30, %c0_31] : memref<2x1xi32, #tpu.memory_space<vmem>>, vector<2x1xi32>
    %45 = vector.broadcast %44 : vector<2x1xi32> to vector<2x8xi32>
    %46 = arith.cmpi eq, %43, %45 : vector<2x8xi32>
    %47 = arith.extui %46 : vector<2x8xi1> to vector<2x8xi32>
    %48 = arith.sitofp %47 : vector<2x8xi32> to vector<2x8xf32>
    %c0_32 = arith.constant 0 : index
    %c0_33 = arith.constant 0 : index
    %49 = vector.load %arg4[%c0_32, %c0_33] : memref<8x32xf32, #tpu.memory_space<vmem>>, vector<8x32xf32>
    %cst_34 = arith.constant dense<0.000000e+00> : vector<2x32xf32>
    %50 = tpu.matmul %48, %49, %cst_34 {dimension_numbers = #tpu.dot_dimension_numbers<[1], [0], [0], [1], [0, 0, 1, 1], [], []>} : vector<2x8xf32>, vector<8x32xf32>, vector<2x32xf32> -> vector<2x32xf32>
    %c0_35 = arith.constant 0 : index
    %51 = memref.load %arg17[%c0_35] : memref<2xf32, #tpu.memory_space<smem>>
    %52 = vector.broadcast %51 : f32 to vector<2x32xf32>
    %53 = arith.mulf %42, %52 : vector<2x32xf32>
    %c0_36 = arith.constant 0 : index
    %54 = memref.load %arg18[%c0_36] : memref<2xf32, #tpu.memory_space<smem>>
    %55 = vector.broadcast %54 : f32 to vector<2x32xf32>
    %56 = arith.addf %53, %55 : vector<2x32xf32>
    %c1 = arith.constant 1 : index
    %57 = memref.load %arg17[%c1] : memref<2xf32, #tpu.memory_space<smem>>
    %58 = vector.broadcast %57 : f32 to vector<2x32xf32>
    %59 = arith.mulf %50, %58 : vector<2x32xf32>
    %c1_37 = arith.constant 1 : index
    %60 = memref.load %arg18[%c1_37] : memref<2xf32, #tpu.memory_space<smem>>
    %61 = vector.broadcast %60 : f32 to vector<2x32xf32>
    %62 = arith.addf %59, %61 : vector<2x32xf32>
    %cst_38 = arith.constant 0.000000e+00 : f32
    %63 = vector.broadcast %cst_38 : f32 to vector<2x1xf32>
    %64 = tpu.concatenate %63, %56, %63 in 1 : vector<2x1xf32>, vector<2x32xf32>, vector<2x1xf32> -> vector<2x34xf32>
    %65 = vector.extract_strided_slice %64 {offsets = [0, 0], sizes = [2, 32], strides = [1, 1]} : vector<2x34xf32> to vector<2x32xf32>
    %66 = vector.extract_strided_slice %64 {offsets = [0, 1], sizes = [2, 32], strides = [1, 1]} : vector<2x34xf32> to vector<2x32xf32>
    %67 = vector.extract_strided_slice %64 {offsets = [0, 2], sizes = [2, 32], strides = [1, 1]} : vector<2x34xf32> to vector<2x32xf32>
    %68 = tpu.concatenate %63, %62, %63 in 1 : vector<2x1xf32>, vector<2x32xf32>, vector<2x1xf32> -> vector<2x34xf32>
    %69 = vector.extract_strided_slice %68 {offsets = [0, 0], sizes = [2, 32], strides = [1, 1]} : vector<2x34xf32> to vector<2x32xf32>
    %70 = vector.extract_strided_slice %68 {offsets = [0, 1], sizes = [2, 32], strides = [1, 1]} : vector<2x34xf32> to vector<2x32xf32>
    %71 = vector.extract_strided_slice %68 {offsets = [0, 2], sizes = [2, 32], strides = [1, 1]} : vector<2x34xf32> to vector<2x32xf32>
    %cst_39 = arith.constant 0.000000e+00 : f32
    %72 = vector.broadcast %cst_39 : f32 to vector<2x32xf32>
    %c0_40 = arith.constant 0 : index
    %73 = memref.load %arg15[%c0_40] : memref<24xf32, #tpu.memory_space<smem>>
    %74 = vector.broadcast %73 : f32 to vector<2x32xf32>
    %75 = arith.mulf %74, %65 : vector<2x32xf32>
    %76 = arith.addf %72, %75 : vector<2x32xf32>
    %c1_41 = arith.constant 1 : index
    %77 = memref.load %arg15[%c1_41] : memref<24xf32, #tpu.memory_space<smem>>
    %78 = vector.broadcast %77 : f32 to vector<2x32xf32>
    %79 = arith.mulf %78, %66 : vector<2x32xf32>
    %80 = arith.addf %76, %79 : vector<2x32xf32>
    %c2 = arith.constant 2 : index
    %81 = memref.load %arg15[%c2] : memref<24xf32, #tpu.memory_space<smem>>
    %82 = vector.broadcast %81 : f32 to vector<2x32xf32>
    %83 = arith.mulf %82, %67 : vector<2x32xf32>
    %84 = arith.addf %80, %83 : vector<2x32xf32>
    %c3 = arith.constant 3 : index
    %85 = memref.load %arg15[%c3] : memref<24xf32, #tpu.memory_space<smem>>
    %86 = vector.broadcast %85 : f32 to vector<2x32xf32>
    %87 = arith.mulf %86, %69 : vector<2x32xf32>
    %88 = arith.addf %84, %87 : vector<2x32xf32>
    %c4 = arith.constant 4 : index
    %89 = memref.load %arg15[%c4] : memref<24xf32, #tpu.memory_space<smem>>
    %90 = vector.broadcast %89 : f32 to vector<2x32xf32>
    %91 = arith.mulf %90, %70 : vector<2x32xf32>
    %92 = arith.addf %88, %91 : vector<2x32xf32>
    %c5 = arith.constant 5 : index
    %93 = memref.load %arg15[%c5] : memref<24xf32, #tpu.memory_space<smem>>
    %94 = vector.broadcast %93 : f32 to vector<2x32xf32>
    %95 = arith.mulf %94, %71 : vector<2x32xf32>
    %96 = arith.addf %92, %95 : vector<2x32xf32>
    %c0_42 = arith.constant 0 : index
    %97 = memref.load %arg16[%c0_42] : memref<4xf32, #tpu.memory_space<smem>>
    %98 = vector.broadcast %97 : f32 to vector<2x32xf32>
    %99 = arith.addf %96, %98 : vector<2x32xf32>
    %c0_43 = arith.constant 0 : index
    %100 = memref.load %arg19[%c0_43] : memref<4xf32, #tpu.memory_space<smem>>
    %101 = vector.broadcast %100 : f32 to vector<2x32xf32>
    %102 = arith.mulf %99, %101 : vector<2x32xf32>
    %c0_44 = arith.constant 0 : index
    %103 = memref.load %arg20[%c0_44] : memref<4xf32, #tpu.memory_space<smem>>
    %104 = vector.broadcast %103 : f32 to vector<2x32xf32>
    %105 = arith.addf %102, %104 : vector<2x32xf32>
    %cst_45 = arith.constant 0.000000e+00 : f32
    %106 = vector.broadcast %cst_45 : f32 to vector<2x32xf32>
    %107 = arith.maximumf %105, %106 : vector<2x32xf32>
    %cst_46 = arith.constant 0.000000e+00 : f32
    %108 = vector.broadcast %cst_46 : f32 to vector<2x32xf32>
    %c6 = arith.constant 6 : index
    %109 = memref.load %arg15[%c6] : memref<24xf32, #tpu.memory_space<smem>>
    %110 = vector.broadcast %109 : f32 to vector<2x32xf32>
    %111 = arith.mulf %110, %65 : vector<2x32xf32>
    %112 = arith.addf %108, %111 : vector<2x32xf32>
    %c7 = arith.constant 7 : index
    %113 = memref.load %arg15[%c7] : memref<24xf32, #tpu.memory_space<smem>>
    %114 = vector.broadcast %113 : f32 to vector<2x32xf32>
    %115 = arith.mulf %114, %66 : vector<2x32xf32>
    %116 = arith.addf %112, %115 : vector<2x32xf32>
    %c8 = arith.constant 8 : index
    %117 = memref.load %arg15[%c8] : memref<24xf32, #tpu.memory_space<smem>>
    %118 = vector.broadcast %117 : f32 to vector<2x32xf32>
    %119 = arith.mulf %118, %67 : vector<2x32xf32>
    %120 = arith.addf %116, %119 : vector<2x32xf32>
    %c9 = arith.constant 9 : index
    %121 = memref.load %arg15[%c9] : memref<24xf32, #tpu.memory_space<smem>>
    %122 = vector.broadcast %121 : f32 to vector<2x32xf32>
    %123 = arith.mulf %122, %69 : vector<2x32xf32>
    %124 = arith.addf %120, %123 : vector<2x32xf32>
    %c10 = arith.constant 10 : index
    %125 = memref.load %arg15[%c10] : memref<24xf32, #tpu.memory_space<smem>>
    %126 = vector.broadcast %125 : f32 to vector<2x32xf32>
    %127 = arith.mulf %126, %70 : vector<2x32xf32>
    %128 = arith.addf %124, %127 : vector<2x32xf32>
    %c11 = arith.constant 11 : index
    %129 = memref.load %arg15[%c11] : memref<24xf32, #tpu.memory_space<smem>>
    %130 = vector.broadcast %129 : f32 to vector<2x32xf32>
    %131 = arith.mulf %130, %71 : vector<2x32xf32>
    %132 = arith.addf %128, %131 : vector<2x32xf32>
    %c1_47 = arith.constant 1 : index
    %133 = memref.load %arg16[%c1_47] : memref<4xf32, #tpu.memory_space<smem>>
    %134 = vector.broadcast %133 : f32 to vector<2x32xf32>
    %135 = arith.addf %132, %134 : vector<2x32xf32>
    %c1_48 = arith.constant 1 : index
    %136 = memref.load %arg19[%c1_48] : memref<4xf32, #tpu.memory_space<smem>>
    %137 = vector.broadcast %136 : f32 to vector<2x32xf32>
    %138 = arith.mulf %135, %137 : vector<2x32xf32>
    %c1_49 = arith.constant 1 : index
    %139 = memref.load %arg20[%c1_49] : memref<4xf32, #tpu.memory_space<smem>>
    %140 = vector.broadcast %139 : f32 to vector<2x32xf32>
    %141 = arith.addf %138, %140 : vector<2x32xf32>
    %cst_50 = arith.constant 0.000000e+00 : f32
    %142 = vector.broadcast %cst_50 : f32 to vector<2x32xf32>
    %143 = arith.maximumf %141, %142 : vector<2x32xf32>
    %cst_51 = arith.constant 0.000000e+00 : f32
    %144 = vector.broadcast %cst_51 : f32 to vector<2x32xf32>
    %c12 = arith.constant 12 : index
    %145 = memref.load %arg15[%c12] : memref<24xf32, #tpu.memory_space<smem>>
    %146 = vector.broadcast %145 : f32 to vector<2x32xf32>
    %147 = arith.mulf %146, %65 : vector<2x32xf32>
    %148 = arith.addf %144, %147 : vector<2x32xf32>
    %c13 = arith.constant 13 : index
    %149 = memref.load %arg15[%c13] : memref<24xf32, #tpu.memory_space<smem>>
    %150 = vector.broadcast %149 : f32 to vector<2x32xf32>
    %151 = arith.mulf %150, %66 : vector<2x32xf32>
    %152 = arith.addf %148, %151 : vector<2x32xf32>
    %c14 = arith.constant 14 : index
    %153 = memref.load %arg15[%c14] : memref<24xf32, #tpu.memory_space<smem>>
    %154 = vector.broadcast %153 : f32 to vector<2x32xf32>
    %155 = arith.mulf %154, %67 : vector<2x32xf32>
    %156 = arith.addf %152, %155 : vector<2x32xf32>
    %c15 = arith.constant 15 : index
    %157 = memref.load %arg15[%c15] : memref<24xf32, #tpu.memory_space<smem>>
    %158 = vector.broadcast %157 : f32 to vector<2x32xf32>
    %159 = arith.mulf %158, %69 : vector<2x32xf32>
    %160 = arith.addf %156, %159 : vector<2x32xf32>
    %c16 = arith.constant 16 : index
    %161 = memref.load %arg15[%c16] : memref<24xf32, #tpu.memory_space<smem>>
    %162 = vector.broadcast %161 : f32 to vector<2x32xf32>
    %163 = arith.mulf %162, %70 : vector<2x32xf32>
    %164 = arith.addf %160, %163 : vector<2x32xf32>
    %c17 = arith.constant 17 : index
    %165 = memref.load %arg15[%c17] : memref<24xf32, #tpu.memory_space<smem>>
    %166 = vector.broadcast %165 : f32 to vector<2x32xf32>
    %167 = arith.mulf %166, %71 : vector<2x32xf32>
    %168 = arith.addf %164, %167 : vector<2x32xf32>
    %c2_52 = arith.constant 2 : index
    %169 = memref.load %arg16[%c2_52] : memref<4xf32, #tpu.memory_space<smem>>
    %170 = vector.broadcast %169 : f32 to vector<2x32xf32>
    %171 = arith.addf %168, %170 : vector<2x32xf32>
    %c2_53 = arith.constant 2 : index
    %172 = memref.load %arg19[%c2_53] : memref<4xf32, #tpu.memory_space<smem>>
    %173 = vector.broadcast %172 : f32 to vector<2x32xf32>
    %174 = arith.mulf %171, %173 : vector<2x32xf32>
    %c2_54 = arith.constant 2 : index
    %175 = memref.load %arg20[%c2_54] : memref<4xf32, #tpu.memory_space<smem>>
    %176 = vector.broadcast %175 : f32 to vector<2x32xf32>
    %177 = arith.addf %174, %176 : vector<2x32xf32>
    %cst_55 = arith.constant 0.000000e+00 : f32
    %178 = vector.broadcast %cst_55 : f32 to vector<2x32xf32>
    %179 = arith.maximumf %177, %178 : vector<2x32xf32>
    %cst_56 = arith.constant 0.000000e+00 : f32
    %180 = vector.broadcast %cst_56 : f32 to vector<2x32xf32>
    %c18 = arith.constant 18 : index
    %181 = memref.load %arg15[%c18] : memref<24xf32, #tpu.memory_space<smem>>
    %182 = vector.broadcast %181 : f32 to vector<2x32xf32>
    %183 = arith.mulf %182, %65 : vector<2x32xf32>
    %184 = arith.addf %180, %183 : vector<2x32xf32>
    %c19 = arith.constant 19 : index
    %185 = memref.load %arg15[%c19] : memref<24xf32, #tpu.memory_space<smem>>
    %186 = vector.broadcast %185 : f32 to vector<2x32xf32>
    %187 = arith.mulf %186, %66 : vector<2x32xf32>
    %188 = arith.addf %184, %187 : vector<2x32xf32>
    %c20 = arith.constant 20 : index
    %189 = memref.load %arg15[%c20] : memref<24xf32, #tpu.memory_space<smem>>
    %190 = vector.broadcast %189 : f32 to vector<2x32xf32>
    %191 = arith.mulf %190, %67 : vector<2x32xf32>
    %192 = arith.addf %188, %191 : vector<2x32xf32>
    %c21 = arith.constant 21 : index
    %193 = memref.load %arg15[%c21] : memref<24xf32, #tpu.memory_space<smem>>
    %194 = vector.broadcast %193 : f32 to vector<2x32xf32>
    %195 = arith.mulf %194, %69 : vector<2x32xf32>
    %196 = arith.addf %192, %195 : vector<2x32xf32>
    %c22 = arith.constant 22 : index
    %197 = memref.load %arg15[%c22] : memref<24xf32, #tpu.memory_space<smem>>
    %198 = vector.broadcast %197 : f32 to vector<2x32xf32>
    %199 = arith.mulf %198, %70 : vector<2x32xf32>
    %200 = arith.addf %196, %199 : vector<2x32xf32>
    %c23 = arith.constant 23 : index
    %201 = memref.load %arg15[%c23] : memref<24xf32, #tpu.memory_space<smem>>
    %202 = vector.broadcast %201 : f32 to vector<2x32xf32>
    %203 = arith.mulf %202, %71 : vector<2x32xf32>
    %204 = arith.addf %200, %203 : vector<2x32xf32>
    %c3_57 = arith.constant 3 : index
    %205 = memref.load %arg16[%c3_57] : memref<4xf32, #tpu.memory_space<smem>>
    %206 = vector.broadcast %205 : f32 to vector<2x32xf32>
    %207 = arith.addf %204, %206 : vector<2x32xf32>
    %c3_58 = arith.constant 3 : index
    %208 = memref.load %arg19[%c3_58] : memref<4xf32, #tpu.memory_space<smem>>
    %209 = vector.broadcast %208 : f32 to vector<2x32xf32>
    %210 = arith.mulf %207, %209 : vector<2x32xf32>
    %c3_59 = arith.constant 3 : index
    %211 = memref.load %arg20[%c3_59] : memref<4xf32, #tpu.memory_space<smem>>
    %212 = vector.broadcast %211 : f32 to vector<2x32xf32>
    %213 = arith.addf %210, %212 : vector<2x32xf32>
    %cst_60 = arith.constant 0.000000e+00 : f32
    %214 = vector.broadcast %cst_60 : f32 to vector<2x32xf32>
    %215 = arith.maximumf %213, %214 : vector<2x32xf32>
    %216 = tpu.concatenate %107, %143, %179, %215 in 1 : vector<2x32xf32>, vector<2x32xf32>, vector<2x32xf32>, vector<2x32xf32> -> vector<2x128xf32>
    %c0_61 = arith.constant 0 : index
    %c0_62 = arith.constant 0 : index
    %217 = vector.load %arg21[%c0_61, %c0_62] : memref<128x32xf32, #tpu.memory_space<vmem>>, vector<128x32xf32>
    %cst_63 = arith.constant dense<0.000000e+00> : vector<2x32xf32>
    %218 = tpu.matmul %216, %217, %cst_63 {dimension_numbers = #tpu.dot_dimension_numbers<[1], [0], [0], [1], [0, 0, 1, 1], [], []>} : vector<2x128xf32>, vector<128x32xf32>, vector<2x32xf32> -> vector<2x32xf32>
    %c0_64 = arith.constant 0 : index
    %c0_65 = arith.constant 0 : index
    %219 = vector.load %arg22[%c0_64, %c0_65] : memref<1x32xf32, #tpu.memory_space<vmem>>, vector<1x32xf32>
    %220 = vector.broadcast %219 : vector<1x32xf32> to vector<2x32xf32>
    %221 = arith.addf %218, %220 : vector<2x32xf32>
    %c0_66 = arith.constant 0 : index
    %c0_67 = arith.constant 0 : index
    %222 = vector.load %arg23[%c0_66, %c0_67] : memref<1x32xf32, #tpu.memory_space<vmem>>, vector<1x32xf32>
    %223 = vector.broadcast %222 : vector<1x32xf32> to vector<2x32xf32>
    %224 = arith.mulf %221, %223 : vector<2x32xf32>
    %c0_68 = arith.constant 0 : index
    %c0_69 = arith.constant 0 : index
    %225 = vector.load %arg24[%c0_68, %c0_69] : memref<1x32xf32, #tpu.memory_space<vmem>>, vector<1x32xf32>
    %226 = vector.broadcast %225 : vector<1x32xf32> to vector<2x32xf32>
    %227 = arith.addf %224, %226 : vector<2x32xf32>
    %cst_70 = arith.constant 0.000000e+00 : f32
    %228 = vector.broadcast %cst_70 : f32 to vector<2x32xf32>
    %229 = arith.maximumf %227, %228 : vector<2x32xf32>
    %cst_71 = arith.constant dense<0.000000e+00> : vector<2x32xf32>
    %230 = tpu.matmul %229, %35, %cst_71 {dimension_numbers = #tpu.dot_dimension_numbers<[1], [1], [0], [0], [0, 0, 1, 0], [], []>} : vector<2x32xf32>, vector<32x32xf32>, vector<2x32xf32> -> vector<2x32xf32>
    %cst_72 = arith.constant 0.000000e+00 : f32
    %231 = vector.broadcast %cst_72 : f32 to vector<2x32xf32>
    %232 = arith.subf %231, %230 : vector<2x32xf32>
    %233 = math.exp %232 : vector<2x32xf32>
    %cst_73 = arith.constant 1.000000e+00 : f32
    %234 = vector.broadcast %cst_73 : f32 to vector<2x32xf32>
    %235 = arith.addf %234, %233 : vector<2x32xf32>
    %cst_74 = arith.constant 1.000000e+00 : f32
    %236 = vector.broadcast %cst_74 : f32 to vector<2x32xf32>
    %237 = arith.divf %236, %235 : vector<2x32xf32>
    %c0_75 = arith.constant 0 : index
    %c0_76 = arith.constant 0 : index
    %238 = vector.load %arg25[%c0_75, %c0_76] : memref<2x32xf32, #tpu.memory_space<vmem>>, vector<2x32xf32>
    tpu.vector_store %arg25[%c0_75, %c0_76], %237 {strides = array<i32>} : memref<2x32xf32, #tpu.memory_space<vmem>>, vector<2x32xf32>,
    return
  }
}

</mosaic_0001>

<bundles_post_ra>
// kernel: tpu_custom_call.1
= control target key start
LH: loop header
LB: loop body
LE: loop exit
PB: predicated region body
PF: predicated region fallthrough
CT: control target
= control target key end

     0   :  { %s2255_s0 = inlined_call_operand.vmem [shape: s32[32,1], index: 0, kind: input, shape index: {}]   ;;  %s2256_s1 = inlined_call_operand.vmem [shape: s32[2,1], index: 1, kind: input, shape index: {}]   ;;  %s2257_s2 = inlined_call_operand.vmem [shape: s32[2,1], index: 2, kind: input, shape index: {}]   ;;  %s2258_s3 = inlined_call_operand.vmem [shape: f32[32,16], index: 3, kind: input, shape index: {}]   ;;  %s2259_s4 = inlined_call_operand.vmem [shape: f32[8,32], index: 4, kind: input, shape index: {}]   ;;  %s2260_s5 = inlined_call_operand.vmem [shape: f32[32,32], index: 5, kind: input, shape index: {}]   ;;  %s2261_s6 = inlined_call_operand.vmem [shape: f32[16,32], index: 6, kind: input, shape index: {}]   ;;  %s2262_s7 = inlined_call_operand.vmem [shape: f32[1,32], index: 7, kind: input, shape index: {}]   ;;  %s2263_s8 = inlined_call_operand.vmem [shape: f32[1,32], index: 8, kind: input, shape index: {}]   ;;  %s2264_s9 = inlined_call_operand.vmem [shape: f32[1,32], index: 9, kind: input, shape index: {}]   ;;  %s2265_s10 = inlined_call_operand.vmem [shape: f32[32,32], index: 10, kind: input, shape index: {}]   ;;  %s2266_s11 = inlined_call_operand.vmem [shape: f32[32,32], index: 11, kind: input, shape index: {}]   ;;  %s2267_s12 = inlined_call_operand.vmem [shape: f32[1,32], index: 12, kind: input, shape index: {}]   ;;  %s2268_s13 = inlined_call_operand.vmem [shape: f32[1,32], index: 13, kind: input, shape index: {}]   ;;  %s2269_s14 = inlined_call_operand.vmem [shape: f32[1,32], index: 14, kind: input, shape index: {}]   ;;  %s2270_s15 = inlined_call_operand.vmem [shape: f32[24], index: 15, kind: input, shape index: {}]   ;;  %s2271_s16 = inlined_call_operand.vmem [shape: f32[4], index: 16, kind: input, shape index: {}]   ;;  %s2272_s17 = inlined_call_operand.vmem [shape: f32[2], index: 17, kind: input, shape index: {}]   ;;  %s2273_s18 = inlined_call_operand.vmem [shape: f32[2], index: 18, kind: input, shape index: {}]   ;;  %s2274_s19 = inlined_call_operand.vmem [shape: f32[4], index: 19, kind: input, shape index: {}]   ;;  %s2275_s20 = inlined_call_operand.vmem [shape: f32[4], index: 20, kind: input, shape index: {}]   ;;  %s2276_s21 = inlined_call_operand.vmem [shape: f32[128,32], index: 21, kind: input, shape index: {}]   ;;  %s2277_s22 = inlined_call_operand.vmem [shape: f32[1,32], index: 22, kind: input, shape index: {}]   ;;  %s2278_s23 = inlined_call_operand.vmem [shape: f32[1,32], index: 23, kind: input, shape index: {}]   ;;  %s2279_s24 = inlined_call_operand.vmem [shape: f32[1,32], index: 24, kind: input, shape index: {}]   ;;  %s2280_s25 = inlined_call_operand.hbm [shape: f32[2,32], index: 25, kind: output, shape index: {}]  }
   0x1   :  { %2285 = sst [smem:[#allocation19_spill]] %s2255_s0 }
   0x2   :  { %2286 = sst [smem:[#allocation20_spill]] %s2256_s1 }
   0x3   :  { %2287 = sst [smem:[#allocation21_spill]] %s2257_s2 }
   0x4   :  { %2288 = sst [smem:[#allocation22_spill]] %s2258_s3 }
   0x5   :  { %2289 = sst [smem:[#allocation23_spill]] %s2259_s4 }
   0x6   :  { %2290 = sst [smem:[#allocation24_spill]] %s2260_s5 }
   0x7   :  { %2291 = sst [smem:[#allocation25_spill]] %s2261_s6 }
   0x8   :  { %2292 = sst [smem:[#allocation26_spill]] %s2262_s7 }
   0x9   :  { %2293 = sst [smem:[#allocation27_spill]] %s2263_s8 }
   0xa   :  { %2294 = sst [smem:[#allocation28_spill]] %s2264_s9 }
   0xb   :  { %30 = vsyncpa [#allocation4], 0 }
   0xc   :  { %31 = vsyncpa [#allocation6], 0 }
   0xd   :  { %32 = vsyncpa [#allocation9], 0 }
   0xe   :  { %33 = vsyncpa [#allocation12], 0  ;;  %s81_s6 = sshll.u32 %s2271_s16, 4  ;;  %s82_s6 = int_to_ptr.vmem [resolvable:$true] %s81_s6 }
   0xf   :  { %34 = vsyncpa [#allocation3], 0  ;;  %s101_s3 = sshll.u32 %s2273_s18, 4  ;;  %s1688_s26 = scalar_lea.vmem %s82_s6, 16  ;;  %s102_s3 = int_to_ptr.vmem [resolvable:$true] %s101_s3 }
  0x10   :  { %p1689_p0 = scmp.ne.s32.totalorder %s82_s6, %s1688_s26  ;;  %p1693_p1 = scmp.lt.s32.totalorder %s82_s6, %s82_s6 }
  0x11   :  { %p1694_p2 = scmp.lt.s32.totalorder %s1688_s26, %s1688_s26 }
  0x13   :  { %p1695_p3 = por %p1694_p2, %p1693_p1 }
  0x15   :  { %p1696_p4 = pnand %p1695_p3, %p1689_p0 }
  0x17   :  { %1699 = shalt.err (!%p1696_p4)
}
  0x18   :  { %s1790_s1 = smov [#allocation5]   ;;  %s1700_s8 = scalar_lea.vmem %s102_s3, 16 }
  0x19   :  { %84 = dma.vmem_to_smem %s82_s6, 16, %s1790_s1, [#allocation6]  }
  0x1a   :  { %p1701_p5 = scmp.ne.s32.totalorder %s102_s3, %s1700_s8  ;;  %p1705_p6 = scmp.lt.s32.totalorder %s102_s3, %s102_s3 }
  0x1b   :  { %p1706_p7 = scmp.lt.s32.totalorder %s1700_s8, %s1700_s8 }
  0x1d   :  { %p1707_p8 = por %p1706_p7, %p1705_p6 }
  0x1f   :  { %p1708_p9 = pnand %p1707_p8, %p1701_p5 }
  0x21   :  { %1711 = shalt.err (!%p1708_p9)
}
  0x22   :  { %s1791_s16 = smov [#allocation8]   ;;  %s71_s4 = sshll.u32 %s2270_s15, 4  ;;  %s72_s4 = int_to_ptr.vmem [resolvable:$true] %s71_s4 }
  0x23   :  { %104 = dma.vmem_to_smem %s102_s3, 16, %s1791_s16, [#allocation9]  }
  0x24   :  { %s91_s5 = sshll.u32 %s2272_s17, 4  ;;  %s1712_s0 = scalar_lea.vmem %s72_s4, 16  ;;  %s92_s5 = int_to_ptr.vmem [resolvable:$true] %s91_s5 }
  0x25   :  { %p1713_p10 = scmp.ne.s32.totalorder %s72_s4, %s1712_s0  ;;  %p1717_p11 = scmp.lt.s32.totalorder %s72_s4, %s72_s4 }
  0x26   :  { %p1718_p12 = scmp.lt.s32.totalorder %s1712_s0, %s1712_s0 }
  0x28   :  { %p1719_p13 = por %p1718_p12, %p1717_p11 }
  0x2a   :  { %p1720_p0 = pnand %p1719_p13, %p1713_p10 }
  0x2c   :  { %1723 = shalt.err (!%p1720_p0)
}
  0x2d   :  { %s1792_s29 = smov [#allocation2]   ;;  %s1724_s2 = scalar_lea.vmem %s92_s5, 16 }
  0x2e   :  { %74 = dma.vmem_to_smem %s72_s4, 16, %s1792_s29, [#allocation4]  }
  0x2f   :  { %p1725_p1 = scmp.ne.s32.totalorder %s92_s5, %s1724_s2  ;;  %p1729_p2 = scmp.lt.s32.totalorder %s92_s5, %s92_s5 }
  0x30   :  { %p1730_p3 = scmp.lt.s32.totalorder %s1724_s2, %s1724_s2 }
  0x32   :  { %p1731_p4 = por %p1730_p3, %p1729_p2 }
  0x34   :  { %p1732_p5 = pnand %p1731_p4, %p1725_p1 }
  0x36   :  { %1735 = shalt.err (!%p1732_p5)
}
  0x37   :  { %s1793_s15 = smov [#allocation7]   ;;  %s111_s30 = sshll.u32 %s2274_s19, 4  ;;  %s112_s30 = int_to_ptr.vmem [resolvable:$true] %s111_s30 }
  0x38   :  { %94 = dma.vmem_to_smem %s92_s5, 16, %s1793_s15, [#allocation6]  }
  0x39   :  { %s121_s26 = sshll.u32 %s2275_s20, 4  ;;  %s1736_s1 = scalar_lea.vmem %s112_s30, 16  ;;  %s122_s26 = int_to_ptr.vmem [resolvable:$true] %s121_s26 }
  0x3a   :  { %p1737_p6 = scmp.ne.s32.totalorder %s112_s30, %s1736_s1  ;;  %p1741_p7 = scmp.lt.s32.totalorder %s112_s30, %s112_s30 }
  0x3b   :  { %p1742_p8 = scmp.lt.s32.totalorder %s1736_s1, %s1736_s1 }
  0x3d   :  { %p1743_p9 = por %p1742_p8, %p1741_p7 }
  0x3f   :  { %p1744_p10 = pnand %p1743_p9, %p1737_p6 }
  0x41   :  { %1747 = shalt.err (!%p1744_p10)
}
  0x42   :  { %s1794_s8 = smov [#allocation10]   ;;  %s1748_s16 = scalar_lea.vmem %s122_s26, 16 }
  0x43   :  { %114 = dma.vmem_to_smem %s112_s30, 16, %s1794_s8, [#allocation9]  }
  0x44   :  { %p1749_p11 = scmp.ne.s32.totalorder %s122_s26, %s1748_s16  ;;  %p1753_p12 = scmp.lt.s32.totalorder %s122_s26, %s122_s26 }
  0x45   :  { %p1754_p13 = scmp.lt.s32.totalorder %s1748_s16, %s1748_s16 }
  0x47   :  { %p1755_p0 = por %p1754_p13, %p1753_p12 }
  0x49   :  { %p1756_p1 = pnand %p1755_p0, %p1749_p11 }
  0x4b   :  { %1759 = shalt.err (!%p1756_p1)
}
  0x4c   :  { %s1795_s19 = smov [#allocation11]  }
  0x4d   :  { %124 = dma.vmem_to_smem %s122_s26, 16, %s1795_s19, [#allocation12]  }
  0x4e   :  { %1780 = dma.done.wait [#allocation4], 16  }
  0x4f   :  { %1781 = vsyncadd [#allocation4], 4294967280 }
  0x50   :  { %1782 = dma.done.wait [#allocation6], 32  }
  0x51   :  { %1783 = vsyncadd [#allocation6], 4294967264 }
  0x52   :  { %1784 = dma.done.wait [#allocation9], 32  }
  0x53   :  { %1785 = vsyncadd [#allocation9], 4294967264 }
  0x54   :  { %1786 = dma.done.wait [#allocation12], 16  }
  0x55   :  { %1787 = vsyncadd [#allocation12], 4294967280 }
  0x56   :  { %151 = sfence }
  0x57   :  { %s2295_s27 = sld [smem:[#allocation19_spill]]  ;;  %v1796_v2 = vmov 0   ;;  %v152_v11 = vlaneseq  ;;  %vm186_vm0 = vcmask 261120   ;;  %v1797_v15 = vmov 0.0   ;;  %v521_v36 = vld [vmem:[%s2266_s11 + $0x18] sm:$0xff]  ;;  %v520_v37 = vld [vmem:[%s2266_s11 + $0x10] sm:$0xff] }
  0x58   :  { %1667 = vset.pattern.permute.xlu1 %v1796_v2  ;;  %1666 = vset.pattern.permute.xlu0 %v1796_v2  ;;  %s2296_s0 = sld [smem:[#allocation22_spill]]  ;;  %vm286_vm5 = vcmask 130048   ;;  %v519_v38 = vld [vmem:[%s2266_s11 + $0x8] sm:$0xff]  ;;  %v518_v39 = vld [vmem:[%s2266_s11] sm:$0xff]  ;;  %vm1798_vm6 = vmmov 0   ;;  %vm841_vm9 = vcmask 64512  }
  0x59   :  { %s2297_s8 = sld [smem:[#allocation21_spill]]  ;;  %v1984_v12 = vand.u32 127, %v152_v11  ;;  %v619_v63 = vld [vmem:[%s2265_s10] sm:$0xff]  ;;  %s1799_s29 = smov 1   ;;  %vm931_vm10 = vcmask 7168   ;;  %vm933_vm11 = vcmask 269312  }
  0x5a   :  { %s2298_s20 = sld [smem:[#allocation20_spill]]  ;;  %v1407_v11 = vld [vmem:[%s2268_s13] ss:$0 sm:$0xff]  ;;  %s1800_s26 = smov 127   ;;  %vm1154_vm12 = vcmask 523264   ;;  %vm1156_vm13 = vcmask 785408  }
  0x5b   :  { %s2299_s9 = sld [smem:[#allocation25_spill]]  ;;  %s1801_s16 = smov 126   ;;  %vm1359_vm14 = vcmask 254976  }
  0x5c   :  { %s2300_s15 = sld [smem:[#allocation24_spill]] }
  0x5d   :  { %v156_v0 = vld [vmem:[%s2295_s27 + $0x10] sm:$0xff]  ;;  %v154_v1 = vld [vmem:[%s2295_s27] sm:$0xff]  ;;  %v157_v5 = vld [vmem:[%s2295_s27 + $0x18] sm:$0xff]  ;;  %s2301_s5 = sld [smem:[#allocation26_spill]] }
  0x5e   :  { %165 = vperm.xlu1 %1667, %v156_v0   ;;  %159 = vperm.xlu0 %1666, %v154_v1   ;;  %v185_v3 = vld [vmem:[%s2296_s0 + $0x18] sm:$0xff]  ;;  %v184_v4 = vld [vmem:[%s2296_s0 + $0x10] sm:$0xff]  ;;  %v155_v6 = vld [vmem:[%s2295_s27 + $0x8] sm:$0xff]  ;;  %s2302_s2 = sld [smem:[#allocation27_spill]] }
  0x5f   :  { %1522 = vmatprep.subr.mxu0 %v185_v3  ;;  %v183_v7 = vld [vmem:[%s2296_s0 + $0x8] sm:$0xff]  ;;  %v833_v8 = vld [vmem:[%s2297_s8] sm:$0x3]  ;;  %s2303_s17 = sld [smem:[#allocation28_spill]] }
  0x60   :  { %1523 = vmatpush3.msra.mxu0 %v185_v3  ;;  %v753_v9 = vld [vmem:[%s2298_s20] sm:$0x3]  ;;  %s915_s28 = sld [smem:[#allocation7]] }
  0x61   :  { %1524 = vmatprep.subr.mxu0 %v184_v4  ;;  %v182_v10 = vld [vmem:[%s2296_s0] sm:$0xff]  ;;  %v285_v22 = vld [vmem:[%s2299_s9 + $0x8] sm:$0xff]  ;;  %s1414_s0 = sld [smem:[#allocation8 + $0x1]] }
  0x62   :  { %168 = vperm.xlu1 %1667, %v157_v5   ;;  %162 = vperm.xlu0 %1666, %v155_v6   ;;  %v284_v23 = vld [vmem:[%s2299_s9] sm:$0xff]  ;;  %v385_v33 = vld [vmem:[%s2300_s15 + $0x8] sm:$0xff]  ;;  %v386_v34 = vld [vmem:[%s2300_s15 + $0x10] sm:$0xff]  ;;  %s918_s9 = sld [smem:[#allocation8]] }
  0x63   :  { %1525 = vmatpush3.msra.mxu0 %v184_v4  ;;  %1536 = vmatprep.subr.mxu1 %v285_v22  ;;  %v384_v28 = vld [vmem:[%s2300_s15] sm:$0xff]  ;;  %v387_v35 = vld [vmem:[%s2300_s15 + $0x18] sm:$0xff]  ;;  %v620_v4 = vld [vmem:[%s2265_s10 + $0x8] sm:$0xff]  ;;  %s1430_s15 = sld [smem:[#allocation2 + $0xd]] }
  0x64   :  { %1526 = vmatprep.subr.mxu0 %v183_v7  ;;  %1537 = vmatpush3.msra.mxu1 %v285_v22  ;;  %v1391_v40 = vld [vmem:[%s2301_s5] ss:$0 sm:$0xff]  ;;  %v621_v5 = vld [vmem:[%s2265_s10 + $0x10] sm:$0xff]  ;;  %v622_v6 = vld [vmem:[%s2265_s10 + $0x18] sm:$0xff]  ;;  %s1413_s5 = sld [smem:[#allocation7 + $0x1]] }
  0x65   :  { %1527 = vmatpush3.msra.mxu0 %v183_v7  ;;  %1538 = vmatprep.subr.mxu1 %v284_v23  ;;  %v1396_v42 = vld [vmem:[%s2302_s2] ss:$0 sm:$0xff]  ;;  %s1421_s2 = sld [smem:[#allocation2 + $0x7]] }
  0x66   :  { %835 = vperm.xlu1 %1667, %v833_v8   ;;  %755 = vperm.xlu0 %1666, %v753_v9   ;;  %v1397_v46 = vld [vmem:[%s2303_s17] ss:$0 sm:$0xff]  ;;  %s1422_s11 = sld [smem:[#allocation2 + $0x8]] }
  0x67   :  { %1528 = vmatprep.subr.mxu0 %v182_v10  ;;  %1539 = vmatpush3.msra.mxu1 %v284_v23  ;;  %v1402_v8 = vld [vmem:[%s2267_s12] ss:$0 sm:$0xff]  ;;  %s1439_s17 = sld [smem:[#allocation2 + $0x13]] }
  0x68   :  { %1529 = vmatpush3.msra.mxu0 %v182_v10  ;;  %s1431_s6 = sld [smem:[#allocation2 + $0xe]] }
  0x69   :  { %1560 = vmatprep.subr.mxu0 %v521_v36  ;;  %s1440_s30 = sld [smem:[#allocation2 + $0x14]] }
  0x6a   :  { %s1433_s7 = sld [smem:[#allocation2 + $0x10]] }
  0x6b   :  { %s1424_s3 = sld [smem:[#allocation2 + $0xa]] }
  0x6c   :  { %s1442_s1 = sld [smem:[#allocation2 + $0x16]] }
  0x6d   :  { %s1425_s8 = sld [smem:[#allocation2 + $0xb]] }
  0x6e   :  { %s1443_s19 = sld [smem:[#allocation2 + $0x17]] }
  0x6f   :  { %s1434_s20 = sld [smem:[#allocation2 + $0x11]] }
  0x70   :  { %s1416_s18 = sld [smem:[#allocation2 + $0x2]] }
  0x71   :  { %s1415_s27 = sld [smem:[#allocation2 + $0x1]] }
  0x72   :  { %s1419_s10 = sld [smem:[#allocation2 + $0x5]] }
  0x73   :  { %s1418_s4 = sld [smem:[#allocation2 + $0x4]] }
  0x74   :  { %s1420_s12 = sld [smem:[#allocation2 + $0x6]] }
  0x75   :  { %s1429_s13 = sld [smem:[#allocation2 + $0xc]] }
  0xd9   :  { %v166_v13 = vpop.permute.xlu1 %165  ;;  %v160_v14 = vpop.permute.xlu0 %159 }
  0xda   :  { %vm170_vm1 = vcmp.eq.s32.totalorder %v1984_v12, %v160_v14  ;;  %vm172_vm2 = vcmp.eq.s32.totalorder %v1984_v12, %v166_v13 }
  0xdb   :  { %v1379_v16 = vsel %vm170_vm1, 1.0, %v1797_v15  ;;  %v1381_v19 = vsel %vm172_vm2, 1.0, %v1797_v15 }
  0xdc   :  { %1530 = vmatprep.mubr.msk.f32.mxu0 %vm186_vm0, %v1379_v16 }
  0xdd   :  { %v169_v17 = vpop.permute.xlu1 %168  ;;  %v163_v18 = vpop.permute.xlu0 %162 }
  0xde   :  { %vm171_vm3 = vcmp.eq.s32.totalorder %v1984_v12, %v163_v18  ;;  %vm173_vm4 = vcmp.eq.s32.totalorder %v1984_v12, %v169_v17 }
  0xdf   :  { %v1380_v20 = vsel %vm171_vm3, 1.0, %v1797_v15  ;;  %v1382_v21 = vsel %vm173_vm4, 1.0, %v1797_v15 }
  0xe0   :  { %1531 = vmatmul.mubr.msk.f32.vlgmr.msra.gmra.mxu0 %vm186_vm0, %v1380_v20 }
  0xe1   :  { %1533 = vmatprep.mubr.msk.f32.mxu0 %vm186_vm0, %v1381_v19  ;;  %1561 = vmatpush3.msra.mxu0 %v521_v36 }
  0xe2   :  { %1562 = vmatprep.subr.mxu0 %v520_v37 }
  0xe3   :  { %1563 = vmatpush3.msra.mxu0 %v520_v37 }
  0xe4   :  { %1534 = vmatmul.mubr.msk.f32.gmra.mxu0 %vm186_vm0, %v1382_v21  ;;  %1564 = vmatprep.subr.mxu0 %v519_v38  ;;  %v1408_v21 = vld [vmem:[%s2269_s14] ss:$0 sm:$0xff]  ;;  %s2304_s14 = sld [smem:[#allocation23_spill]] }
  0xe5   :  { %1565 = vmatpush3.msra.mxu0 %v519_v38  ;;  %v919_v38 = vstv %s918_s9  ;;  %s1432_s9 = sld [smem:[#allocation2 + $0xf]] }
  0xe6   :  { %1566 = vmatprep.subr.mxu0 %v518_v39 }
  0xe7   :  { %1567 = vmatpush3.msra.mxu0 %v518_v39 }
  0xe8   :  { %1588 = vmatprep.subr.mxu0 %v1797_v15 }
 0x1a0   :  { %v1532_v24 = vpop.f32.mrf.mxu0 }
 0x1a2   :  { %v265_v25 = vpop.f32.mrf.mxu0 }
 0x1a3   :  { %1540 = vmatprep.mubr.msk.f32.mxu1 %vm286_vm5, %v265_v25 }
 0x1a4   :  { %v1535_v26 = vpop.f32.mrf.mxu0  ;;  %1541 = vmatmul.mubr.msk.f32.vlgmr.msra.gmra.mxu1 %vm286_vm5, %v1532_v24 }
 0x1a6   :  { %v275_v27 = vpop.f32.mrf.mxu0 }
 0x1a7   :  { %1543 = vmatprep.mubr.msk.f32.mxu1 %vm286_vm5, %v275_v27 }
 0x1a8   :  { %1544 = vmatmul.mubr.msk.f32.gmra.mxu1 %vm286_vm5, %v1535_v26 }
 0x1a9   :  { %1554 = vmatprep.mubr.msk.f32.mxu1 %vm186_vm0, %v384_v28 }
 0x264   :  { %v1542_v29 = vpop.f32.mrf.mxu1 }
 0x266   :  { %v365_v30 = vpop.f32.mrf.mxu1 }
 0x268   :  { %v1545_v31 = vpop.f32.mrf.mxu1 }
 0x269   :  { %1546 = vmatprep.subr.mxu1 %v1545_v31 }
 0x26a   :  { %v375_v32 = vpop.f32.mrf.mxu1  ;;  %1547 = vmatpush3.msra.mxu1 %v1545_v31 }
 0x26b   :  { %1548 = vmatprep.subr.mxu1 %v375_v32 }
 0x26c   :  { %1549 = vmatpush3.msra.mxu1 %v375_v32  ;;  %v836_v32 = vpop.permute.xlu1 %835 }
 0x26d   :  { %1550 = vmatprep.subr.mxu1 %v1542_v29  ;;  %vm837_vm8 = vcmp.eq.s32.totalorder %v1984_v12, %v836_v32  ;;  %v1165_v32 = vld [vmem:[%s2276_s21 + $0x38] sm:$0xff] }
 0x26e   :  { %1551 = vmatpush3.msra.mxu1 %v1542_v29  ;;  %v756_v29 = vpop.permute.xlu0 %755  ;;  %v1411_v36 = vsel %vm837_vm8, 1.0, %v1797_v15 }
 0x26f   :  { %1552 = vmatprep.subr.mxu1 %v365_v30  ;;  %vm757_vm7 = vcmp.eq.s32.totalorder %v1984_v12, %v756_v29  ;;  %v916_v12 = vstv %s915_s28  ;;  %v1168_v29 = vld [vmem:[%s2276_s21 + $0x50] sm:$0xff]  ;;  %s1423_s28 = sld [smem:[#allocation2 + $0x9]] }
 0x270   :  { %1553 = vmatpush3.msra.mxu1 %v365_v30 }
 0x271   :  { %1555 = vmatmul.mubr.msk.f32.vlgmr.msra.gmra.mxu1 %vm186_vm0, %v385_v33 }
 0x272   :  { %1557 = vmatprep.mubr.msk.f32.mxu1 %vm186_vm0, %v386_v34  ;;  %v840_v34 = vld [vmem:[%s2304_s14] sm:$0xff]  ;;  %s1438_s14 = sld [smem:[#allocation2 + $0x12]] }
 0x275   :  { %1558 = vmatmul.mubr.msk.f32.gmra.mxu1 %vm186_vm0, %v387_v35  ;;  %v1409_v35 = vsel %vm757_vm7, 1.0, %v1797_v15 }
 0x276   :  { %1582 = vmatprep.mubr.msk.f32.mxu1 %vm186_vm0, %v619_v63 }
 0x331   :  { %v1556_v41 = vpop.f32.mrf.mxu1 }
 0x332   :  { %v479_v43 = vadd.f32 %v1556_v41, %v1391_v40  ;;  %v922_v41 = vstv %s1413_s5  ;;  %s1441_s5 = sld [smem:[#allocation2 + $0x15]] }
 0x333   :  { %v473_v44 = vpop.f32.mrf.mxu1 }
 0x334   :  { %v500_v45 = vmul.f32 %v1396_v42, %v479_v43  ;;  %v474_v47 = vadd.f32 %v1391_v40, %v473_v44  ;;  %v925_v44 = vstv %s1414_s0  ;;  %s2196_s0 = sld [smem:[#allocation2]] }
 0x335   :  { %v1559_v48 = vpop.f32.mrf.mxu1 }
 0x336   :  { %v499_v49 = vmul.f32 %v1396_v42, %v474_v47  ;;  %v489_v50 = vadd.f32 %v1559_v48, %v1391_v40  ;;  %v511_v51 = vadd.f32 %v1397_v46, %v500_v45 }
 0x337   :  { %v483_v52 = vpop.f32.mrf.mxu1 }
 0x338   :  { %v510_v53 = vadd.f32 %v1397_v46, %v499_v49  ;;  %v502_v54 = vmul.f32 %v1396_v42, %v489_v50  ;;  %v484_v55 = vadd.f32 %v1391_v40, %v483_v52  ;;  %v996_v49 = vstv %s1421_s2  ;;  %s1426_s2 = sld [smem:[#allocation5 + $0x1]] }
 0x339   :  { %v1046_v50 = vstv %s1430_s15  ;;  %s2201_s15 = sld [smem:[#allocation10 + $0x1]] }
 0x33a   :  { %1668 = vtanh.f32 %v510_v53  ;;  %v501_v56 = vmul.f32 %v1396_v42, %v484_v55  ;;  %v513_v57 = vadd.f32 %v1397_v46, %v502_v54  ;;  %v1004_v55 = vstv %s1422_s11  ;;  %s2204_s11 = sld [smem:[#allocation5 + $0x2]] }
 0x33b   :  { %1670 = vtanh.f32 %v511_v51 }
 0x33c   :  { %v512_v58 = vadd.f32 %v1397_v46, %v501_v56  ;;  %v1096_v56 = vstv %s1439_s17  ;;  %s2206_s17 = sld [smem:[#allocation5 + $0x3]] }
 0x33e   :  { %1672 = vtanh.f32 %v512_v58 }
 0x33f   :  { %1674 = vtanh.f32 %v513_v57 }
 0x347   :  { %v1669_v59 = vpop.eup %1668 }
 0x348   :  { %v1671_v60 = vpop.eup %1670  ;;  %1568 = vmatprep.mubr.msk.f32.mxu0 %vm186_vm0, %v1669_v59 }
 0x349   :  { %1569 = vmatmul.mubr.msk.f32.vlgmr.msra.gmra.mxu0 %vm186_vm0, %v1671_v60  ;;  %v1054_v60 = vstv %s1431_s6  ;;  %s2208_s6 = sld [smem:[#allocation11 + $0x1]] }
 0x34b   :  { %v1673_v61 = vpop.eup %1672 }
 0x34c   :  { %v1675_v62 = vpop.eup %1674  ;;  %1571 = vmatprep.mubr.msk.f32.mxu0 %vm186_vm0, %v1673_v61  ;;  %v1104_v61 = vstv %s1440_s30  ;;  %s2210_s30 = sld [smem:[#allocation10 + $0x2]] }
 0x34d   :  { %1572 = vmatmul.mubr.msk.f32.gmra.mxu0 %vm186_vm0, %v1675_v62 }
 0x34e   :  { %1596 = vmatprep.mubr.msk.f32.mxu0 %vm1798_vm6, %v1797_v15 }
 0x409   :  { %v1570_v0 = vpop.f32.mrf.mxu0 }
 0x40b   :  { %v600_v1 = vpop.f32.mrf.mxu0 }
 0x40d   :  { %v1573_v2 = vpop.f32.mrf.mxu0 }
 0x40e   :  { %1574 = vmatprep.subr.mxu1 %v1573_v2 }
 0x40f   :  { %v610_v3 = vpop.f32.mrf.mxu0  ;;  %1575 = vmatpush3.msra.mxu1 %v1573_v2  ;;  %v1066_v2 = vstv %s1433_s7  ;;  %s2212_s7 = sld [smem:[#allocation10 + $0x3]] }
 0x410   :  { %1576 = vmatprep.subr.mxu1 %v610_v3 }
 0x411   :  { %1577 = vmatpush3.msra.mxu1 %v610_v3  ;;  %v1016_v3 = vstv %s1424_s3 }
 0x412   :  { %1578 = vmatprep.subr.mxu1 %v1570_v0 }
 0x413   :  { %1579 = vmatpush3.msra.mxu1 %v1570_v0 }
 0x414   :  { %1580 = vmatprep.subr.mxu1 %v600_v1 }
 0x415   :  { %1581 = vmatpush3.msra.mxu1 %v600_v1 }
 0x416   :  { %1583 = vmatmul.mubr.msk.f32.vlgmr.msra.gmra.mxu1 %vm186_vm0, %v620_v4  ;;  %1604 = vmatprep.subr.mxu1 %v1797_v15 }
 0x417   :  { %1585 = vmatprep.mubr.msk.f32.mxu1 %vm186_vm0, %v621_v5 }
 0x41a   :  { %1586 = vmatmul.mubr.msk.f32.gmra.mxu1 %vm186_vm0, %v622_v6  ;;  %v1116_v6 = vstv %s1442_s1 }
 0x41b   :  { %1636 = vmatprep.mubr.msk.f32.mxu1 %vm1798_vm6, %v1797_v15 }
 0x4d6   :  { %v1584_v7 = vpop.f32.mrf.mxu1 }
 0x4d7   :  { %v714_v10 = vadd.f32 %v1584_v7, %v1402_v8  ;;  %v1024_v7 = vstv %s1425_s8 }
 0x4d8   :  { %v708_v9 = vpop.f32.mrf.mxu1 }
 0x4d9   :  { %v709_v14 = vadd.f32 %v1402_v8, %v708_v9  ;;  %v735_v18 = vmul.f32 %v1407_v11, %v714_v10  ;;  %v1124_v10 = vstv %s1443_s19  ;;  %s2222_s19 = sld [smem:[#allocation11 + $0x3]] }
 0x4da   :  { %v1587_v13 = vpop.f32.mrf.mxu1 }
 0x4db   :  { %v724_v16 = vadd.f32 %v1587_v13, %v1402_v8  ;;  %v734_v22 = vmul.f32 %v1407_v11, %v709_v14  ;;  %v746_v25 = vadd.f32 %v1408_v21, %v735_v18 }
 0x4dc   :  { %v718_v17 = vpop.f32.mrf.mxu1 }
 0x4dd   :  { %v737_v19 = vmul.f32 %v1407_v11, %v724_v16  ;;  %v719_v20 = vadd.f32 %v1402_v8, %v718_v17  ;;  %v745_v27 = vadd.f32 %v1408_v21, %v734_v22  ;;  %v954_v16 = vstv %s1416_s18  ;;  %v1173_v22 = vld [vmem:[%s2276_s21 + $0x78] sm:$0xff] }
 0x4de   :  { %v946_v17 = vstv %s1415_s27  ;;  %1605 = vmatpush3.msra.mxu1 %v1173_v22  ;;  %v1038_v22 = vstv %s2208_s6  ;;  %s1803_s27 = smov 64  }
 0x4df   :  { %v748_v23 = vadd.f32 %v1408_v21, %v737_v19  ;;  %v736_v24 = vmul.f32 %v1407_v11, %v719_v20  ;;  %v1074_v11 = vstv %s1434_s20  ;;  %v974_v20 = vstv %s1419_s10  ;;  %1606 = vmatprep.subr.mxu1 %v1797_v15  ;;  %s1804_s10 = smov 96  }
 0x4e1   :  { %1676 = vtanh.f32 %v748_v23  ;;  %v747_v26 = vadd.f32 %v1408_v21, %v736_v24  ;;  %v966_v21 = vstv %s1418_s4  ;;  %s981_s4 = sld [smem:[#allocation5]] }
 0x4e3   :  { %1678 = vtanh.f32 %v747_v26  ;;  %v1171_v26 = vld [vmem:[%s2276_s21 + $0x68] sm:$0xff] }
 0x4e4   :  { %1680 = vtanh.f32 %v746_v25  ;;  %v1172_v25 = vld [vmem:[%s2276_s21 + $0x70] sm:$0xff] }
 0x4e5   :  { %1682 = vtanh.f32 %v745_v27  ;;  %1607 = vmatpush3.msra.mxu1 %v1172_v25  ;;  %v1170_v27 = vld [vmem:[%s2276_s21 + $0x60] sm:$0xff]  ;;  %v1085_v25 = vstv %s2210_s30 }
 0x4e6   :  { %1608 = vmatprep.subr.mxu1 %v1797_v15 }
 0x4e7   :  { %1609 = vmatpush3.msra.mxu1 %v1171_v26  ;;  %v1135_v26 = vstv %s2212_s7 }
 0x4e8   :  { %1610 = vmatprep.subr.mxu1 %v1797_v15 }
 0x4e9   :  { %1611 = vmatpush3.msra.mxu1 %v1170_v27 }
 0x4ea   :  { %1612 = vmatprep.subr.mxu1 %v1797_v15 }
 0x4ee   :  { %v1677_v28 = vpop.eup %1676 }
 0x4ef   :  { %1589 = vmatpush3.msra.mxu0 %v1677_v28 }
 0x4f0   :  { %v1679_v30 = vpop.eup %1678  ;;  %1590 = vmatprep.subr.mxu0 %v1797_v15 }
 0x4f1   :  { %1591 = vmatpush3.msra.mxu0 %v1679_v30  ;;  %v1681_v31 = vpop.eup %1680 }
 0x4f2   :  { %1592 = vmatprep.subr.mxu0 %v1797_v15  ;;  %v1683_v33 = vpop.eup %1682 }
 0x4f3   :  { %1593 = vmatpush3.msra.mxu0 %v1681_v31 }
 0x4f4   :  { %1594 = vmatprep.subr.mxu0 %v1797_v15 }
 0x4f5   :  { %1595 = vmatpush3.msra.mxu0 %v1683_v33 }
 0x4f6   :  { %1597 = vmatmul.mubr.msk.f32.vlgmr.msra.gmra.mxu0 %vm186_vm0, %v1409_v35  ;;  %1599 = vmatprep.subr.mxu0 %v1797_v15  ;;  %v1162_v35 = vld [vmem:[%s2276_s21 + $0x20] sm:$0xff] }
 0x4f7   :  { %1600 = vmatpush3.msra.mxu0 %v840_v34  ;;  %1601 = vmatprep.mubr.msk.f32.mxu0 %vm1798_vm6, %v1797_v15  ;;  %v1163_v34 = vld [vmem:[%s2276_s21 + $0x28] sm:$0xff] }
 0x4f8   :  { %1639 = vmatprep.subr.mxu0 %v1797_v15 }
 0x4fa   :  { %1602 = vmatmul.mubr.msk.f32.vlgmr.msra.gmra.mxu0 %vm841_vm9, %v1411_v36  ;;  %v1161_v36 = vld [vmem:[%s2276_s21 + $0x18] sm:$0xff] }
 0x4fb   :  { %1640 = vmatpush3.xpose.msk.msra.mxu0 %vm186_vm0, %v1677_v28  ;;  %1647 = vmatprep.mubr.msk.f32.mxu0 %vm1798_vm6, %v1797_v15  ;;  %v1169_v28 = vld [vmem:[%s2276_s21 + $0x58] sm:$0xff] }
 0x4fc   :  { %1641 = vmatprep.subr.mxu0 %v1797_v15  ;;  %1613 = vmatpush3.msra.mxu1 %v1169_v28 }
 0x4fd   :  { %1614 = vmatprep.subr.mxu1 %v1797_v15 }
 0x4fe   :  { %1615 = vmatpush3.msra.mxu1 %v1168_v29 }
 0x4ff   :  { %1642 = vmatpush3.xpose.msk.msra.mxu0 %vm186_vm0, %v1679_v30  ;;  %v1167_v30 = vld [vmem:[%s2276_s21 + $0x48] sm:$0xff]  ;;  %1616 = vmatprep.subr.mxu1 %v1797_v15 }
 0x500   :  { %1643 = vmatprep.subr.mxu0 %v1797_v15  ;;  %1617 = vmatpush3.msra.mxu1 %v1167_v30 }
 0x501   :  { %1618 = vmatprep.subr.mxu1 %v1797_v15 }
 0x503   :  { %1644 = vmatpush3.xpose.msk.msra.mxu0 %vm186_vm0, %v1681_v31  ;;  %v1166_v31 = vld [vmem:[%s2276_s21 + $0x40] sm:$0xff] }
 0x504   :  { %1645 = vmatprep.subr.mxu0 %v1797_v15  ;;  %1619 = vmatpush3.msra.mxu1 %v1166_v31 }
 0x505   :  { %1620 = vmatprep.subr.mxu1 %v1797_v15 }
 0x506   :  { %1621 = vmatpush3.msra.mxu1 %v1165_v32 }
 0x507   :  { %1646 = vmatpush3.xpose.msk.msra.mxu0 %vm186_vm0, %v1683_v33  ;;  %v1164_v33 = vld [vmem:[%s2276_s21 + $0x30] sm:$0xff]  ;;  %1622 = vmatprep.subr.mxu1 %v1797_v15 }
 0x508   :  { %1623 = vmatpush3.msra.mxu1 %v1164_v33 }
 0x509   :  { %1624 = vmatprep.subr.mxu1 %v1797_v15 }
 0x50a   :  { %1625 = vmatpush3.msra.mxu1 %v1163_v34  ;;  %v1138_v34 = vstv %s2222_s19 }
 0x50b   :  { %1626 = vmatprep.subr.mxu1 %v1797_v15 }
 0x50c   :  { %1627 = vmatpush3.msra.mxu1 %v1162_v35 }
 0x50d   :  { %1628 = vmatprep.subr.mxu1 %v1797_v15 }
 0x50e   :  { %1629 = vmatpush3.msra.mxu1 %v1161_v36 }
 0x50f   :  { %1630 = vmatprep.subr.mxu1 %v1797_v15 }
 0x5b6   :  { %v829_v37 = vpop.f32.mrf.mxu0 }
 0x5b7   :  { %v917_v39 = vmul.f32 %v916_v12, %v829_v37  ;;  %v992_v12 = vstv %s1420_s12  ;;  %s984_s12 = sld [smem:[#allocation10]] }
 0x5b8   :  { %v1598_v40 = vpop.f32.mrf.mxu0 }
 0x5b9   :  { %v920_v42 = vadd.f32 %v919_v38, %v917_v39  ;;  %v1042_v40 = vstv %s1429_s13  ;;  %s987_s13 = sld [smem:[#allocation11]] }
 0x5ba   :  { %v911_v43 = vpop.f32.mrf.mxu0 }
 0x5bb   :  { %v923_v45 = vmul.f32 %v922_v41, %v911_v43  ;;  %928 = vrot.lane.b32.xlu0 %v920_v42, %s1799_s29  ;;  %v1092_v41 = vstv %s1438_s14  ;;  %v1012_v42 = vstv %s1423_s28 }
 0x5bc   :  { %v1603_v46 = vpop.f32.mrf.mxu0 }
 0x5bd   :  { %v926_v47 = vadd.f32 %v925_v44, %v923_v45 }
 0x5bf   :  { %936 = vrot.lane.b32.xlu1 %v926_v47, %s1799_s29  ;;  %s2198_s29 = sld [smem:[#allocation2 + $0x3]] }
 0x5c5   :  { %v962_v32 = vstv %s2198_s29 }
 0x62d   :  { %v929_v48 = vpop.permute.xlu0 %928 }
 0x62e   :  { %v932_v51 = vsel %vm931_vm10, 0.0, %v929_v48 }
 0x62f   :  { %v2102_v52 = vsel %vm933_vm11, %v932_v51, 0.0  ;;  %v1112_v51 = vstv %s1441_s5 }
 0x630   :  { %v997_v53 = vmul.f32 %v996_v49, %v2102_v52  ;;  %v1047_v54 = vmul.f32 %v1046_v50, %v2102_v52  ;;  %v1005_v58 = vmul.f32 %v1004_v55, %v2102_v52  ;;  %v1097_v59 = vmul.f32 %v1096_v56, %v2102_v52 }
 0x631   :  { %v937_v57 = vpop.permute.xlu1 %936  ;;  %v1055_v63 = vmul.f32 %v1054_v60, %v2102_v52  ;;  %v1105_v0 = vmul.f32 %v1104_v61, %v2102_v52  ;;  %v955_v18 = vmul.f32 %v954_v16, %v2102_v52  ;;  %v947_v19 = vmul.f32 %v946_v17, %v2102_v52  ;;  %v1158_v16 = vld [vmem:[%s2276_s21] sm:$0xff] }
 0x632   :  { %999 = vrot.lane.b32.xlu0 %v997_v53, %s1800_s26  ;;  %1049 = vrot.lane.b32.xlu1 %v1047_v54, %s1800_s26  ;;  %v939_v62 = vsel %vm931_vm10, 0.0, %v937_v57  ;;  %v993_v39 = vmul.f32 %v992_v12, %v2102_v52  ;;  %v1043_v46 = vmul.f32 %v1042_v40, %v2102_v52  ;;  %v1093_v48 = vmul.f32 %v1092_v41, %v2102_v52 }
 0x633   :  { %v2116_v1 = vsel %vm933_vm11, %v939_v62, 0.0  ;;  %v1062_v50 = vstv %s1432_s9  ;;  %v1082_v17 = vstv %s2204_s11 }
 0x634   :  { %v1067_v4 = vmul.f32 %v1066_v2, %v2116_v1  ;;  %v1017_v5 = vmul.f32 %v1016_v3, %v2116_v1  ;;  %v1117_v8 = vmul.f32 %v1116_v6, %v2116_v1  ;;  %v1025_v9 = vmul.f32 %v1024_v7, %v2116_v1  ;;  %v1160_v3 = vld [vmem:[%s2276_s21 + $0x10] sm:$0xff] }
 0x635   :  { %v1125_v13 = vmul.f32 %v1124_v10, %v2116_v1  ;;  %v1075_v14 = vmul.f32 %v1074_v11, %v2116_v1  ;;  %v975_v23 = vmul.f32 %v974_v20, %v2116_v1  ;;  %v967_v24 = vmul.f32 %v966_v21, %v2116_v1  ;;  %1631 = vmatpush3.msra.mxu1 %v1160_v3  ;;  %v1449_v3 = vld [vmem:[%s2279_s24] ss:$0 sm:$0xff] }
 0x636   :  { %1007 = vrot.lane.b32.xlu0 %v1005_v58, %s1801_s16  ;;  %1099 = vrot.lane.b32.xlu1 %v1097_v59, %s1800_s26  ;;  %v1013_v49 = vmul.f32 %v1012_v42, %v2116_v1  ;;  %v1063_v60 = vmul.f32 %v1062_v50, %v2116_v1  ;;  %v1113_v61 = vmul.f32 %v1112_v51, %v2116_v1  ;;  %v1032_v6 = vstv %s1426_s2 }
 0x637   :  { %1632 = vmatprep.subr.mxu1 %v1797_v15  ;;  %v1035_v10 = vstv %s2201_s15  ;;  %v942_v21 = vstv %s2196_s0  ;;  %v963_v40 = vmul.f32 %v962_v32, %v2116_v1  ;;  %v985_v51 = vstv %s984_s12 }
 0x638   :  { %v943_v29 = vmul.f32 %v942_v21, %v2102_v52 }
 0x63a   :  { %1057 = vrot.lane.b32.xlu0 %v1055_v63, %s1801_s16  ;;  %1107 = vrot.lane.b32.xlu1 %v1105_v0, %s1801_s16 }
 0x63e   :  { %1069 = vrot.lane.b32.xlu1 %v1067_v4, %s1800_s26  ;;  %1019 = vrot.lane.b32.xlu0 %v1017_v5, %s1800_s26  ;;  %v1159_v4 = vld [vmem:[%s2276_s21 + $0x8] sm:$0xff]  ;;  %s1802_s21 = smov 32  }
 0x63f   :  { %1633 = vmatpush3.msra.mxu1 %v1159_v4 }
 0x640   :  { %1634 = vmatprep.subr.mxu1 %v1797_v15 }
 0x641   :  { %1635 = vmatpush3.msra.mxu1 %v1158_v16 }
 0x642   :  { %1119 = vrot.lane.b32.xlu1 %v1117_v8, %s1800_s26  ;;  %1027 = vrot.lane.b32.xlu0 %v1025_v9, %s1801_s16 }
 0x646   :  { %1127 = vrot.lane.b32.xlu1 %v1125_v13, %s1801_s16  ;;  %1077 = vrot.lane.b32.xlu0 %v1075_v14, %s1801_s16 }
 0x64a   :  { %957 = vrot.lane.b32.xlu1 %v955_v18, %s1801_s16  ;;  %949 = vrot.lane.b32.xlu0 %v947_v19, %s1800_s26  ;;  %v1132_v19 = vstv %s2206_s17 }
 0x64e   :  { %977 = vrot.lane.b32.xlu1 %v975_v23, %s1801_s16  ;;  %969 = vrot.lane.b32.xlu0 %v967_v24, %s1800_s26  ;;  %s2220_s16 = sld [smem:[#allocation11 + $0x2]] }
 0x654   :  { %v1088_v33 = vstv %s2220_s16 }
 0x6a4   :  { %v1000_v37 = vpop.permute.xlu0 %999  ;;  %v1050_v38 = vpop.permute.xlu1 %1049 }
 0x6a5   :  { %v1002_v43 = vadd.f32 %v1000_v37, %v993_v39  ;;  %v1052_v53 = vadd.f32 %v1050_v38, %v1043_v46 }
 0x6a8   :  { %v1008_v44 = vpop.permute.xlu0 %1007  ;;  %v1100_v45 = vpop.permute.xlu1 %1099 }
 0x6a9   :  { %v1010_v47 = vadd.f32 %v1008_v44, %v1002_v43  ;;  %v1102_v54 = vadd.f32 %v1100_v45, %v1093_v48 }
 0x6ab   :  { %v1014_v55 = vadd.f32 %v1013_v49, %v1010_v47  ;;  %v982_v49 = vstv %s981_s4 }
 0x6ac   :  { %v1058_v56 = vpop.permute.xlu0 %1057  ;;  %v1108_v57 = vpop.permute.xlu1 %1107 }
 0x6ad   :  { %v1060_v58 = vadd.f32 %v1058_v56, %v1052_v53  ;;  %v1110_v59 = vadd.f32 %v1108_v57, %v1102_v54  ;;  %v988_v53 = vstv %s987_s13 }
 0x6af   :  { %v1064_v62 = vadd.f32 %v1063_v60, %v1060_v58  ;;  %v1114_v63 = vadd.f32 %v1113_v61, %v1110_v59 }
 0x6b0   :  { %v1020_v0 = vpop.permute.xlu0 %1019  ;;  %v1070_v2 = vpop.permute.xlu1 %1069 }
 0x6b1   :  { %v1022_v5 = vadd.f32 %v1020_v0, %v1014_v55  ;;  %v1072_v11 = vadd.f32 %v1070_v2, %v1064_v62  ;;  %v1447_v62 = vld [vmem:[%s2277_s22] ss:$0 sm:$0xff]  ;;  %s1805_s22 = smov [#allocation13]  }
 0x6b2   :  { %v1448_v0 = vld [vmem:[%s2278_s23] ss:$0 sm:$0xff]  ;;  %s1367_s23 = sshll.u32 %s1805_s22, 4  ;;  %s1368_s23 = int_to_ptr.vmem [resolvable:$true] %s1367_s23 }
 0x6b3   :  { %s1760_s24 = scalar_lea.vmem %s1368_s23, 32  ;;  %p1765_p3 = scmp.lt.s32.totalorder %s1368_s23, %s1368_s23 }
 0x6b4   :  { %v1028_v7 = vpop.permute.xlu0 %1027  ;;  %v1120_v8 = vpop.permute.xlu1 %1119  ;;  %p1761_p2 = scmp.ne.s32.totalorder %s1368_s23, %s1760_s24  ;;  %p1766_p4 = scmp.lt.s32.totalorder %s1760_s24, %s1760_s24 }
 0x6b5   :  { %v1030_v9 = vadd.f32 %v1028_v7, %v1022_v5  ;;  %v1122_v14 = vadd.f32 %v1120_v8, %v1114_v63 }
 0x6b6   :  { %p1767_p5 = por %p1766_p4, %p1765_p3 }
 0x6b7   :  { %v1033_v13 = vadd.f32 %v1032_v6, %v1030_v9 }
 0x6b8   :  { %v1078_v18 = vpop.permute.xlu0 %1077  ;;  %v1128_v20 = vpop.permute.xlu1 %1127  ;;  %p1768_p6 = pnand %p1767_p5, %p1761_p2 }
 0x6b9   :  { %v1036_v23 = vmul.f32 %v1035_v10, %v1033_v13  ;;  %v1080_v15 = vadd.f32 %v1078_v18, %v1072_v11  ;;  %v1130_v24 = vadd.f32 %v1128_v20, %v1122_v14 }
 0x6bb   :  { %v1083_v27 = vadd.f32 %v1082_v17, %v1080_v15  ;;  %v1133_v28 = vadd.f32 %v1132_v19, %v1130_v24  ;;  %v1039_v30 = vadd.f32 %v1038_v22, %v1036_v23 }
 0x6bc   :  { %v950_v31 = vpop.permute.xlu0 %949  ;;  %v958_v38 = vpop.permute.xlu1 %957 }
 0x6bd   :  { %v1086_v35 = vmul.f32 %v1085_v25, %v1083_v27  ;;  %v1136_v36 = vmul.f32 %v1135_v26, %v1133_v28  ;;  %v952_v12 = vadd.f32 %v950_v31, %v943_v29  ;;  %v1040_v37 = vmax.f32 %v1039_v30, 0.0 }
 0x6bf   :  { %v960_v39 = vadd.f32 %v958_v38, %v952_v12  ;;  %1142 = vrot.lane.b32.xlu0 %v1040_v37, %s1802_s21  ;;  %v1089_v41 = vadd.f32 %v1088_v33, %v1086_v35  ;;  %v1139_v42 = vadd.f32 %v1138_v34, %v1136_v36 }
 0x6c0   :  { %v970_v45 = vpop.permute.xlu0 %969  ;;  %v978_v47 = vpop.permute.xlu1 %977 }
 0x6c1   :  { %v964_v43 = vadd.f32 %v963_v40, %v960_v39  ;;  %v1090_v44 = vmax.f32 %v1089_v41, 0.0  ;;  %v1140_v52 = vmax.f32 %v1139_v42, 0.0 }
 0x6c3   :  { %1146 = vrot.lane.b32.xlu1 %v1090_v44, %s1803_s27  ;;  %1150 = vrot.lane.b32.xlu0 %v1140_v52, %s1804_s10  ;;  %v972_v46 = vadd.f32 %v970_v45, %v964_v43 }
 0x6c5   :  { %v980_v48 = vadd.f32 %v978_v47, %v972_v46 }
 0x6c7   :  { %v983_v50 = vadd.f32 %v982_v49, %v980_v48 }
 0x6c9   :  { %v986_v1 = vmul.f32 %v985_v51, %v983_v50 }
 0x6cb   :  { %v989_v54 = vadd.f32 %v988_v53, %v986_v1 }
 0x6cd   :  { %v990_v56 = vmax.f32 %v989_v54, 0.0 }
 0x731   :  { %v1143_v55 = vpop.permute.xlu0 %1142 }
 0x732   :  { %v1153_v57 = vsel %vm186_vm0, %v990_v56, %v1143_v55 }
 0x735   :  { %v1151_v58 = vpop.permute.xlu0 %1150  ;;  %v1147_v59 = vpop.permute.xlu1 %1146 }
 0x736   :  { %v1155_v60 = vsel %vm1154_vm12, %v1153_v57, %v1147_v59 }
 0x737   :  { %v1157_v61 = vsel %vm1156_vm13, %v1155_v60, %v1151_v58 }
 0x738   :  { %1637 = vmatmul.mubr.f32.vlgmr.msra.gmra.mxu1 %v1157_v61 }
 0x7f8   :  { %v1247_v63 = vpop.f32.mrf.mxu1 }
 0x7f9   :  { %v1248_v2 = vadd.f32 %v1447_v62, %v1247_v63 }
 0x7fa   :  { %v1638_v4 = vpop.f32.mrf.mxu1 }
 0x7fb   :  { %v1258_v5 = vmul.f32 %v1448_v0, %v1248_v2 }
 0x7fd   :  { %v1266_v6 = vadd.f32 %v1449_v3, %v1258_v5 }
 0x7ff   :  { %v1267_v7 = vmax.f32 %v1266_v6, 0.0 }
 0x801   :  { %1648 = vmatmul.mubr.msk.f32.vlgmr.msra.gmra.mxu0 %vm186_vm0, %v1267_v7 }
 0x8c1   :  { %v1349_v8 = vpop.f32.mrf.mxu0 }
 0x8c2   :  { %v1353_v9 = vsub.f32 0.0, %v1349_v8 }
 0x8c3   :  { %v1649_v10 = vpop.f32.mrf.mxu0 }
 0x8c4   :  { %v1354_v11 = vmul.f32 1.442695, %v1353_v9 }
 0x8c6   :  { %1684 = vpow2.f32 %v1354_v11 }
 0x8d3   :  { %v1685_v13 = vpop.eup %1684 }
 0x8d4   :  { %v1356_v14 = vadd.f32 1.0, %v1685_v13 }
 0x8d6   :  { %1686 = vrcp.f32 %v1356_v14 }
 0x8e3   :  { %v1687_v16 = vpop.eup %1686 }
 0x8e4   :  { %1360 = vst.msk [vmem:[#allocation13] sm:$0x3] %vm1359_vm14, %v1687_v16 }
 0x8e5   :  { %1771 = shalt.err (!%p1768_p6)
}
 0x8e6   :  { %1370 = dma.vmem_to_hbm [thread:$0]  %s1368_s23, 32, %s2280_s25, [#allocation3]  }
 0x8e7   :  { %1788 = dma.done.wait [#allocation3], 32  }
 0x8e8   :  { %1789 = vsyncadd [#allocation3], 4294967264 }
 0x8e9   :  { %1374 = vsyncpa [#allocation3], 1 }
 0x8ea   :  { %1375 = vsyncpa [#allocation4], 1 }
 0x8eb   :  { %1376 = vsyncpa [#allocation6], 1 }
 0x8ec   :  { %1377 = vsyncpa [#allocation9], 1 }
 0x8ed   :  { %1378 = vsyncpa [#allocation12], 1 }

</bundles_post_ra>
